<compile_context>
chip_gen: v6e
topology: v6e:2x2x1
jax: 0.10.0
libtpu: 0.0.40
codegen_flags: <defaults>
</compile_context>

<pallas_src>
import functools

import jax
import jax.numpy as jnp
from jax import lax
from jax.experimental import pallas as pl
from jax.experimental.pallas import tpu as pltpu


def _round_up(x, m):
    return ((x + m - 1) // m) * m


def _bilinear_align_corners(x, out_h, out_w):
    # x: (N, Hin, Win, C) float32.  Matches F.interpolate(mode='bilinear',
    # align_corners=True).
    n, hin, win, c = x.shape
    dt = x.dtype

    def coords(out, inn):
        src = jnp.arange(out, dtype=dt) * ((inn - 1) / max(out - 1, 1))
        i0 = jnp.clip(jnp.floor(src).astype(jnp.int32), 0, inn - 1)
        i1 = jnp.clip(i0 + 1, 0, inn - 1)
        return i0, i1, src - i0.astype(dt)

    h0, h1, wh = coords(out_h, hin)
    w0, w1, ww = coords(out_w, win)
    wh = wh[None, :, None, None]
    ww = ww[None, None, :, None]
    x_h0 = x[:, h0, :, :]
    x_h1 = x[:, h1, :, :]
    top = x_h0[:, :, w0, :] * (1.0 - ww) + x_h0[:, :, w1, :] * ww
    bot = x_h1[:, :, w0, :] * (1.0 - ww) + x_h1[:, :, w1, :] * ww
    return top * (1.0 - wh) + bot * wh


def _decoder_kernel(x_ref, y_ref, m_ref, w1_ref, s1_ref, t1_ref, w2_ref, b2_ref,
                    loss_ref, *, Pe, Lp, M0, Wp):
    # x_ref:  (1, C_in, Xlen)  zero-padded upsampled features (lane = flat pixel)
    # y_ref:  (1, 3, Lp)       target pixels over the output window
    # m_ref:  (1, Pe)          1.0 at interior pixels, 0.0 at padding / tail
    # w1_ref: (9, C1p, C_in)   conv1 weights, one (C1p, C_in) slab per 3x3 tap
    # s1/t1:  (C1p, 1)         folded eval-BN scale / shift (conv1 bias folded in)
    # w2_ref: (9, 3, C1p)      conv2 weights per 3x3 tap
    # b2_ref: (3, 1)           conv2 bias
    x = x_ref[0]
    y = y_ref[0]
    m_full = m_ref[...]

    # 3x3 tap lane-offsets (identical for both convs in this flattened layout).
    offs = [ky * Wp + kx for ky in range(3) for kx in range(3)]     # 0 .. 2*M0

    # ---- conv1 (3x3, pad=1): in-kernel im2col via 9-tap accumulation of
    #      small MXU matmuls over static lane-shifted views of x ----
    # TODO(synk): training-mode BatchNorm (batch statistics) not implemented;
    # eval-mode running-stat semantics are used.
    h = jnp.dot(w1_ref[0], x[:, offs[0]:offs[0] + Pe],
                preferred_element_type=jnp.float32)                 # (C1p, Pe)
    for t in range(1, 9):
        h = h + jnp.dot(w1_ref[t], x[:, offs[t]:offs[t] + Pe],
                        preferred_element_type=jnp.float32)
    h = jnp.maximum(h * s1_ref[...] + t1_ref[...], 0.0) * m_full    # zero at pads

    # ---- conv2 (3x3, pad=1): 9-tap accumulation over lane-shifted views of
    #      the masked hidden activation (no (9*C1p, L) concat materialized) ----
    z = jnp.dot(w2_ref[0], h[:, offs[0]:offs[0] + Lp],
                preferred_element_type=jnp.float32)                 # (3, Lp)
    for t in range(1, 9):
        z = z + jnp.dot(w2_ref[t], h[:, offs[t]:offs[t] + Lp],
                        preferred_element_type=jnp.float32)
    z = z + b2_ref[...]

    # ---- Sigmoid + BCE fused in logits form, masked to interior pixels ----
    # (PyTorch's -100 log clamp only differs for |z| > 100.)
    m_win = m_full[:, M0:M0 + Lp]                                   # (1, Lp)
    per = (jnp.maximum(z, 0.0) - z * y +
           jnp.log(1.0 + jnp.exp(-jnp.abs(z)))) * m_win
    loss_ref[...] = jnp.sum(per).reshape(1, 1, 1)


def decoder_infopro_forward(features_nchw, image_nchw, params, image_size):
    feat = jnp.transpose(features_nchw, (0, 2, 3, 1)).astype(jnp.float32)   # NHWC
    img = image_nchw.astype(jnp.float32)                                    # NCHW
    N = feat.shape[0]
    C_in = feat.shape[-1]
    H = W = image_size
    Hp, Wp = H + 2, W + 2
    P = Hp * Wp               # zero-padded spatial positions
    L = H * Wp                # output window (rows 1..H of the padded grid)
    M0 = Wp + 1               # flattened padded index of interior (1, 1)
    # Lane-dense (multiple-of-128) sizes: padded output window, extended hidden
    # window (every 3x3 shift stays in-bounds), padded input window.
    Lp = _round_up(L, 128)
    Pe = _round_up(Lp + 2 * M0, 128)
    Xlen = _round_up(Pe + 2 * M0, 128)

    # ---- glue: bilinear (align_corners=True) upsample, pad, channel-major slab ----
    # TODO(synk): the upsample could be fused in-kernel as two separable
    # interpolation matmuls to cut HBM traffic further for large feature maps.
    up = _bilinear_align_corners(feat, H, W)                                # (N,H,W,Cin)
    xpad = jnp.pad(up, ((0, 0), (1, 1), (1, 1), (0, 0)))                    # (N,Hp,Wp,Cin)
    xflat = jnp.transpose(xpad, (0, 3, 1, 2)).reshape(N, C_in, P)
    x_ext = jnp.pad(xflat, ((0, 0), (0, 0), (M0, Xlen - P - M0)))           # (N,Cin,Xlen)

    # Target pixels over the output window, channels on sublanes / pixels on lanes.
    ipad = jnp.pad(img, ((0, 0), (0, 0), (1, 1), (1, 1))).reshape(N, 3, P)
    y_sl = ipad[:, :, M0:M0 + L]
    y_sl = jnp.pad(y_sl, ((0, 0), (0, 0), (0, Lp - L)))                     # (N,3,Lp)

    # Interior-pixel mask over the extended hidden window.
    mgrid = jnp.pad(jnp.ones((H, W), jnp.float32), ((1, 1), (1, 1))).reshape(P)
    m_full = jnp.pad(mgrid, (0, Pe - P)).reshape(1, Pe)                     # (1,Pe)

    # ---- fold conv1 bias + eval BatchNorm into per-channel scale/shift;
    #      pad hidden channels to a multiple of 8 for aligned sublane tiles ----
    w1, b1 = params["w1"], params["b1"]          # HWIO (3,3,Cin,C1), (C1,)
    C1 = w1.shape[-1]
    C1p = _round_up(C1, 8)
    pc = C1p - C1
    scale = params["bn_gamma"] / jnp.sqrt(params["bn_var"] + 1e-5)
    shift = scale * (b1 - params["bn_mean"]) + params["bn_beta"]
    w1t = jnp.transpose(w1.reshape(9, C_in, C1), (0, 2, 1))                 # (9,C1,Cin)
    w1t = jnp.pad(w1t, ((0, 0), (0, pc), (0, 0)))                           # (9,C1p,Cin)
    s1 = jnp.pad(scale, (0, pc)).reshape(C1p, 1)
    t1 = jnp.pad(shift, (0, pc)).reshape(C1p, 1)
    w2t = jnp.transpose(params["w2"].reshape(9, C1, 3), (0, 2, 1))          # (9,3,C1)
    w2t = jnp.pad(w2t, ((0, 0), (0, 0), (0, pc)))                           # (9,3,C1p)
    b2 = params["b2"].reshape(3, 1)

    kernel = functools.partial(_decoder_kernel, Pe=Pe, Lp=Lp, M0=M0, Wp=Wp)

    # Scoped-VMEM budget from the actual per-step footprint (double-buffered
    # inputs + hidden activation + temporaries), capped at v7x's 64 MiB.
    in_bytes = 4 * (C_in * Xlen + 3 * Lp + Pe
                    + 9 * C1p * C_in + 2 * C1p + 9 * 3 * C1p + 3)
    act_bytes = 4 * (3 * C1p * Pe + 4 * 3 * Lp)
    vmem_limit = int(min(max(2 * in_bytes + act_bytes + (4 << 20), 16 << 20),
                         64 << 20))

    # TODO(synk): for image_size >~ 256, add a row-block grid axis (1-row halo)
    # so per-step blocks stay ~1-2 MB instead of scaling with image_size^2.
    partial_loss = pl.pallas_call(
        kernel,
        out_shape=jax.ShapeDtypeStruct((N, 1, 1), jnp.float32),
        grid_spec=pltpu.PrefetchScalarGridSpec(
            num_scalar_prefetch=0,
            grid=(N,),
            in_specs=[
                pl.BlockSpec((1, C_in, Xlen), lambda n: (n, 0, 0)),  # features
                pl.BlockSpec((1, 3, Lp), lambda n: (n, 0, 0)),       # targets
                pl.BlockSpec((1, Pe), lambda n: (0, 0)),             # interior mask
                pl.BlockSpec((9, C1p, C_in), lambda n: (0, 0, 0)),   # conv1 weights
                pl.BlockSpec((C1p, 1), lambda n: (0, 0)),            # bn scale
                pl.BlockSpec((C1p, 1), lambda n: (0, 0)),            # bn shift
                pl.BlockSpec((9, 3, C1p), lambda n: (0, 0, 0)),      # conv2 weights
                pl.BlockSpec((3, 1), lambda n: (0, 0)),              # conv2 bias
            ],
            out_specs=pl.BlockSpec((1, 1, 1), lambda n: (n, 0, 0)),
        ),
        compiler_params=pltpu.CompilerParams(
            dimension_semantics=("parallel",),
            vmem_limit_bytes=vmem_limit),
    )(x_ext, y_sl, m_full, w1t, s1, t1, w2t, b2)

    return jnp.sum(partial_loss) / (N * H * W * 3)


def _reference(features_nchw, image_nchw, params, image_size):
    feat = jnp.transpose(features_nchw, (0, 2, 3, 1)).astype(jnp.float32)
    img = jnp.transpose(image_nchw, (0, 2, 3, 1)).astype(jnp.float32)
    up = _bilinear_align_corners(feat, image_size, image_size)
    dn = ("NHWC", "HWIO", "NHWC")
    y1 = lax.conv_general_dilated(up, params["w1"], (1, 1), "SAME",
                                  dimension_numbers=dn) + params["b1"]
    scale = params["bn_gamma"] / jnp.sqrt(params["bn_var"] + 1e-5)
    y1 = (y1 - params["bn_mean"]) * scale + params["bn_beta"]
    y1 = jnp.maximum(y1, 0.0)
    y2 = lax.conv_general_dilated(y1, params["w2"], (1, 1), "SAME",
                                  dimension_numbers=dn) + params["b2"]
    p = jax.nn.sigmoid(y2)
    lp = jnp.maximum(jnp.log(p), -100.0)
    lq = jnp.maximum(jnp.log(1.0 - p), -100.0)
    return jnp.mean(-(img * lp + (1.0 - img) * lq))


if __name__ == "__main__":
    key = jax.random.PRNGKey(0)
    k = jax.random.split(key, 8)
    N, C_in, Hf, Wf = 2, 4, 8, 8
    image_size = 16
    widen = 1
    C1 = int(12 * widen)

    # PyTorch-style inputs: features (N, C, h, w) NCHW; image_ori (N, 3, H, W) in [0,1].
    features = jax.random.normal(k[0], (N, C_in, Hf, Wf), jnp.float32)
    image_ori = jax.random.uniform(k[1], (N, 3, image_size, image_size), jnp.float32)

    params = dict(
        w1=0.2 * jax.random.normal(k[2], (3, 3, C_in, C1), jnp.float32),
        b1=0.05 * jax.random.normal(k[3], (C1,), jnp.float32),
        bn_gamma=1.0 + 0.1 * jax.random.normal(k[4], (C1,), jnp.float32),
        bn_beta=0.05 * jax.random.normal(k[5], (C1,), jnp.float32),
        bn_mean=jnp.zeros((C1,), jnp.float32),
        bn_var=jnp.ones((C1,), jnp.float32),
        w2=0.2 * jax.random.normal(k[6], (3, 3, C1, 3), jnp.float32),
        b2=0.05 * jax.random.normal(k[7], (3,), jnp.float32),
    )

    loss = decoder_infopro_forward(features, image_ori, params, image_size)
    loss = jax.block_until_ready(loss)
    ref = _reference(features, image_ori, params, image_size)
    assert jnp.allclose(loss, ref, rtol=1e-4, atol=1e-4), (float(loss), float(ref))
    print("KERNEL_OK")
</pallas_src>

<mosaic_0001>
module attributes {stable_mosaic.version = 11 : i64} {
  func.func @_decoder_kernel(%arg0: i32, %arg1: memref<1x4x640xf32, #tpu.memory_space<vmem>>, %arg2: memref<1x3x384xf32, #tpu.memory_space<vmem>>, %arg3: memref<1x512xf32, #tpu.memory_space<vmem>>, %arg4: memref<9x16x4xf32, #tpu.memory_space<vmem>>, %arg5: memref<16x1xf32, #tpu.memory_space<vmem>>, %arg6: memref<16x1xf32, #tpu.memory_space<vmem>>, %arg7: memref<9x3x16xf32, #tpu.memory_space<vmem>>, %arg8: memref<3x1xf32, #tpu.memory_space<vmem>>, %arg9: memref<1x1x1xf32, #tpu.memory_space<vmem>>) attributes {dimension_semantics = [#tpu.dimension_semantics<parallel>], iteration_bounds = array<i64: 2>, scalar_prefetch = 0 : i64, scratch_operands = 0 : i64, tpu.core_type = #tpu.core_type<tc>, window_params = [{transform_indices = @transform_0, window_bounds = array<i64: 1, 4, 640>}, {transform_indices = @transform_1, window_bounds = array<i64: 1, 3, 384>}, {pipeline_mode = #tpu.pipeline_mode<synchronous>, transform_indices = @transform_2, window_bounds = array<i64: 1, 512>}, {pipeline_mode = #tpu.pipeline_mode<synchronous>, transform_indices = @transform_3, window_bounds = array<i64: 9, 16, 4>}, {pipeline_mode = #tpu.pipeline_mode<synchronous>, transform_indices = @transform_4, window_bounds = array<i64: 16, 1>}, {pipeline_mode = #tpu.pipeline_mode<synchronous>, transform_indices = @transform_5, window_bounds = array<i64: 16, 1>}, {pipeline_mode = #tpu.pipeline_mode<synchronous>, transform_indices = @transform_6, window_bounds = array<i64: 9, 3, 16>}, {pipeline_mode = #tpu.pipeline_mode<synchronous>, transform_indices = @transform_7, window_bounds = array<i64: 3, 1>}, {transform_indices = @transform_8, window_bounds = array<i64: 1, 1, 1>}]} {
    %c0 = arith.constant 0 : index
    %c0_0 = arith.constant 0 : index
    %c0_1 = arith.constant 0 : index
    %0 = vector.load %arg1[%c0, %c0_0, %c0_1] : memref<1x4x640xf32, #tpu.memory_space<vmem>>, vector<1x4x640xf32>
    %1 = vector.shape_cast %0 : vector<1x4x640xf32> to vector<4x640xf32>
    %c0_2 = arith.constant 0 : index
    %c0_3 = arith.constant 0 : index
    %c0_4 = arith.constant 0 : index
    %2 = vector.load %arg2[%c0_2, %c0_3, %c0_4] : memref<1x3x384xf32, #tpu.memory_space<vmem>>, vector<1x3x384xf32>
    %3 = vector.shape_cast %2 : vector<1x3x384xf32> to vector<3x384xf32>
    %c0_5 = arith.constant 0 : index
    %c0_6 = arith.constant 0 : index
    %4 = vector.load %arg3[%c0_5, %c0_6] : memref<1x512xf32, #tpu.memory_space<vmem>>, vector<1x512xf32>
    %c0_7 = arith.constant 0 : index
    %c0_8 = arith.constant 0 : index
    %c0_9 = arith.constant 0 : index
    %5 = vector.load %arg4[%c0_7, %c0_8, %c0_9] : memref<9x16x4xf32, #tpu.memory_space<vmem>>, vector<1x16x4xf32>
    %6 = vector.shape_cast %5 : vector<1x16x4xf32> to vector<16x4xf32>
    %7 = vector.extract_strided_slice %1 {offsets = [0, 0], sizes = [4, 512], strides = [1, 1]} : vector<4x640xf32> to vector<4x512xf32>
    %cst = arith.constant dense<0.000000e+00> : vector<16x512xf32>
    %8 = tpu.matmul %6, %7, %cst {dimension_numbers = #tpu.dot_dimension_numbers<[1], [0], [0], [1], [0, 0, 1, 1], [], []>} : vector<16x4xf32>, vector<4x512xf32>, vector<16x512xf32> -> vector<16x512xf32>
    %c1 = arith.constant 1 : index
    %c0_10 = arith.constant 0 : index
    %c0_11 = arith.constant 0 : index
    %9 = vector.load %arg4[%c1, %c0_10, %c0_11] : memref<9x16x4xf32, #tpu.memory_space<vmem>>, vector<1x16x4xf32>
    %10 = vector.shape_cast %9 : vector<1x16x4xf32> to vector<16x4xf32>
    %11 = vector.extract_strided_slice %1 {offsets = [0, 1], sizes = [4, 512], strides = [1, 1]} : vector<4x640xf32> to vector<4x512xf32>
    %cst_12 = arith.constant dense<0.000000e+00> : vector<16x512xf32>
    %12 = tpu.matmul %10, %11, %cst_12 {dimension_numbers = #tpu.dot_dimension_numbers<[1], [0], [0], [1], [0, 0, 1, 1], [], []>} : vector<16x4xf32>, vector<4x512xf32>, vector<16x512xf32> -> vector<16x512xf32>
    %13 = arith.addf %8, %12 : vector<16x512xf32>
    %c2 = arith.constant 2 : index
    %c0_13 = arith.constant 0 : index
    %c0_14 = arith.constant 0 : index
    %14 = vector.load %arg4[%c2, %c0_13, %c0_14] : memref<9x16x4xf32, #tpu.memory_space<vmem>>, vector<1x16x4xf32>
    %15 = vector.shape_cast %14 : vector<1x16x4xf32> to vector<16x4xf32>
    %16 = vector.extract_strided_slice %1 {offsets = [0, 2], sizes = [4, 512], strides = [1, 1]} : vector<4x640xf32> to vector<4x512xf32>
    %cst_15 = arith.constant dense<0.000000e+00> : vector<16x512xf32>
    %17 = tpu.matmul %15, %16, %cst_15 {dimension_numbers = #tpu.dot_dimension_numbers<[1], [0], [0], [1], [0, 0, 1, 1], [], []>} : vector<16x4xf32>, vector<4x512xf32>, vector<16x512xf32> -> vector<16x512xf32>
    %18 = arith.addf %13, %17 : vector<16x512xf32>
    %c3 = arith.constant 3 : index
    %c0_16 = arith.constant 0 : index
    %c0_17 = arith.constant 0 : index
    %19 = vector.load %arg4[%c3, %c0_16, %c0_17] : memref<9x16x4xf32, #tpu.memory_space<vmem>>, vector<1x16x4xf32>
    %20 = vector.shape_cast %19 : vector<1x16x4xf32> to vector<16x4xf32>
    %21 = vector.extract_strided_slice %1 {offsets = [0, 18], sizes = [4, 512], strides = [1, 1]} : vector<4x640xf32> to vector<4x512xf32>
    %cst_18 = arith.constant dense<0.000000e+00> : vector<16x512xf32>
    %22 = tpu.matmul %20, %21, %cst_18 {dimension_numbers = #tpu.dot_dimension_numbers<[1], [0], [0], [1], [0, 0, 1, 1], [], []>} : vector<16x4xf32>, vector<4x512xf32>, vector<16x512xf32> -> vector<16x512xf32>
    %23 = arith.addf %18, %22 : vector<16x512xf32>
    %c4 = arith.constant 4 : index
    %c0_19 = arith.constant 0 : index
    %c0_20 = arith.constant 0 : index
    %24 = vector.load %arg4[%c4, %c0_19, %c0_20] : memref<9x16x4xf32, #tpu.memory_space<vmem>>, vector<1x16x4xf32>
    %25 = vector.shape_cast %24 : vector<1x16x4xf32> to vector<16x4xf32>
    %26 = vector.extract_strided_slice %1 {offsets = [0, 19], sizes = [4, 512], strides = [1, 1]} : vector<4x640xf32> to vector<4x512xf32>
    %cst_21 = arith.constant dense<0.000000e+00> : vector<16x512xf32>
    %27 = tpu.matmul %25, %26, %cst_21 {dimension_numbers = #tpu.dot_dimension_numbers<[1], [0], [0], [1], [0, 0, 1, 1], [], []>} : vector<16x4xf32>, vector<4x512xf32>, vector<16x512xf32> -> vector<16x512xf32>
    %28 = arith.addf %23, %27 : vector<16x512xf32>
    %c5 = arith.constant 5 : index
    %c0_22 = arith.constant 0 : index
    %c0_23 = arith.constant 0 : index
    %29 = vector.load %arg4[%c5, %c0_22, %c0_23] : memref<9x16x4xf32, #tpu.memory_space<vmem>>, vector<1x16x4xf32>
    %30 = vector.shape_cast %29 : vector<1x16x4xf32> to vector<16x4xf32>
    %31 = vector.extract_strided_slice %1 {offsets = [0, 20], sizes = [4, 512], strides = [1, 1]} : vector<4x640xf32> to vector<4x512xf32>
    %cst_24 = arith.constant dense<0.000000e+00> : vector<16x512xf32>
    %32 = tpu.matmul %30, %31, %cst_24 {dimension_numbers = #tpu.dot_dimension_numbers<[1], [0], [0], [1], [0, 0, 1, 1], [], []>} : vector<16x4xf32>, vector<4x512xf32>, vector<16x512xf32> -> vector<16x512xf32>
    %33 = arith.addf %28, %32 : vector<16x512xf32>
    %c6 = arith.constant 6 : index
    %c0_25 = arith.constant 0 : index
    %c0_26 = arith.constant 0 : index
    %34 = vector.load %arg4[%c6, %c0_25, %c0_26] : memref<9x16x4xf32, #tpu.memory_space<vmem>>, vector<1x16x4xf32>
    %35 = vector.shape_cast %34 : vector<1x16x4xf32> to vector<16x4xf32>
    %36 = vector.extract_strided_slice %1 {offsets = [0, 36], sizes = [4, 512], strides = [1, 1]} : vector<4x640xf32> to vector<4x512xf32>
    %cst_27 = arith.constant dense<0.000000e+00> : vector<16x512xf32>
    %37 = tpu.matmul %35, %36, %cst_27 {dimension_numbers = #tpu.dot_dimension_numbers<[1], [0], [0], [1], [0, 0, 1, 1], [], []>} : vector<16x4xf32>, vector<4x512xf32>, vector<16x512xf32> -> vector<16x512xf32>
    %38 = arith.addf %33, %37 : vector<16x512xf32>
    %c7 = arith.constant 7 : index
    %c0_28 = arith.constant 0 : index
    %c0_29 = arith.constant 0 : index
    %39 = vector.load %arg4[%c7, %c0_28, %c0_29] : memref<9x16x4xf32, #tpu.memory_space<vmem>>, vector<1x16x4xf32>
    %40 = vector.shape_cast %39 : vector<1x16x4xf32> to vector<16x4xf32>
    %41 = vector.extract_strided_slice %1 {offsets = [0, 37], sizes = [4, 512], strides = [1, 1]} : vector<4x640xf32> to vector<4x512xf32>
    %cst_30 = arith.constant dense<0.000000e+00> : vector<16x512xf32>
    %42 = tpu.matmul %40, %41, %cst_30 {dimension_numbers = #tpu.dot_dimension_numbers<[1], [0], [0], [1], [0, 0, 1, 1], [], []>} : vector<16x4xf32>, vector<4x512xf32>, vector<16x512xf32> -> vector<16x512xf32>
    %43 = arith.addf %38, %42 : vector<16x512xf32>
    %c8 = arith.constant 8 : index
    %c0_31 = arith.constant 0 : index
    %c0_32 = arith.constant 0 : index
    %44 = vector.load %arg4[%c8, %c0_31, %c0_32] : memref<9x16x4xf32, #tpu.memory_space<vmem>>, vector<1x16x4xf32>
    %45 = vector.shape_cast %44 : vector<1x16x4xf32> to vector<16x4xf32>
    %46 = vector.extract_strided_slice %1 {offsets = [0, 38], sizes = [4, 512], strides = [1, 1]} : vector<4x640xf32> to vector<4x512xf32>
    %cst_33 = arith.constant dense<0.000000e+00> : vector<16x512xf32>
    %47 = tpu.matmul %45, %46, %cst_33 {dimension_numbers = #tpu.dot_dimension_numbers<[1], [0], [0], [1], [0, 0, 1, 1], [], []>} : vector<16x4xf32>, vector<4x512xf32>, vector<16x512xf32> -> vector<16x512xf32>
    %48 = arith.addf %43, %47 : vector<16x512xf32>
    %c0_34 = arith.constant 0 : index
    %c0_35 = arith.constant 0 : index
    %49 = vector.load %arg5[%c0_34, %c0_35] : memref<16x1xf32, #tpu.memory_space<vmem>>, vector<16x1xf32>
    %50 = vector.broadcast %49 : vector<16x1xf32> to vector<16x512xf32>
    %51 = arith.mulf %48, %50 : vector<16x512xf32>
    %c0_36 = arith.constant 0 : index
    %c0_37 = arith.constant 0 : index
    %52 = vector.load %arg6[%c0_36, %c0_37] : memref<16x1xf32, #tpu.memory_space<vmem>>, vector<16x1xf32>
    %53 = vector.broadcast %52 : vector<16x1xf32> to vector<16x512xf32>
    %54 = arith.addf %51, %53 : vector<16x512xf32>
    %cst_38 = arith.constant 0.000000e+00 : f32
    %55 = vector.broadcast %cst_38 : f32 to vector<16x512xf32>
    %56 = arith.maximumf %54, %55 : vector<16x512xf32>
    %57 = vector.broadcast %4 : vector<1x512xf32> to vector<16x512xf32>
    %58 = arith.mulf %56, %57 : vector<16x512xf32>
    %c0_39 = arith.constant 0 : index
    %c0_40 = arith.constant 0 : index
    %c0_41 = arith.constant 0 : index
    %59 = vector.load %arg7[%c0_39, %c0_40, %c0_41] : memref<9x3x16xf32, #tpu.memory_space<vmem>>, vector<1x3x16xf32>
    %60 = vector.shape_cast %59 : vector<1x3x16xf32> to vector<3x16xf32>
    %61 = vector.extract_strided_slice %58 {offsets = [0, 0], sizes = [16, 384], strides = [1, 1]} : vector<16x512xf32> to vector<16x384xf32>
    %cst_42 = arith.constant dense<0.000000e+00> : vector<3x384xf32>
    %62 = tpu.matmul %60, %61, %cst_42 {dimension_numbers = #tpu.dot_dimension_numbers<[1], [0], [0], [1], [0, 0, 1, 1], [], []>} : vector<3x16xf32>, vector<16x384xf32>, vector<3x384xf32> -> vector<3x384xf32>
    %c1_43 = arith.constant 1 : index
    %c0_44 = arith.constant 0 : index
    %c0_45 = arith.constant 0 : index
    %63 = vector.load %arg7[%c1_43, %c0_44, %c0_45] : memref<9x3x16xf32, #tpu.memory_space<vmem>>, vector<1x3x16xf32>
    %64 = vector.shape_cast %63 : vector<1x3x16xf32> to vector<3x16xf32>
    %65 = vector.extract_strided_slice %58 {offsets = [0, 1], sizes = [16, 384], strides = [1, 1]} : vector<16x512xf32> to vector<16x384xf32>
    %cst_46 = arith.constant dense<0.000000e+00> : vector<3x384xf32>
    %66 = tpu.matmul %64, %65, %cst_46 {dimension_numbers = #tpu.dot_dimension_numbers<[1], [0], [0], [1], [0, 0, 1, 1], [], []>} : vector<3x16xf32>, vector<16x384xf32>, vector<3x384xf32> -> vector<3x384xf32>
    %67 = arith.addf %62, %66 : vector<3x384xf32>
    %c2_47 = arith.constant 2 : index
    %c0_48 = arith.constant 0 : index
    %c0_49 = arith.constant 0 : index
    %68 = vector.load %arg7[%c2_47, %c0_48, %c0_49] : memref<9x3x16xf32, #tpu.memory_space<vmem>>, vector<1x3x16xf32>
    %69 = vector.shape_cast %68 : vector<1x3x16xf32> to vector<3x16xf32>
    %70 = vector.extract_strided_slice %58 {offsets = [0, 2], sizes = [16, 384], strides = [1, 1]} : vector<16x512xf32> to vector<16x384xf32>
    %cst_50 = arith.constant dense<0.000000e+00> : vector<3x384xf32>
    %71 = tpu.matmul %69, %70, %cst_50 {dimension_numbers = #tpu.dot_dimension_numbers<[1], [0], [0], [1], [0, 0, 1, 1], [], []>} : vector<3x16xf32>, vector<16x384xf32>, vector<3x384xf32> -> vector<3x384xf32>
    %72 = arith.addf %67, %71 : vector<3x384xf32>
    %c3_51 = arith.constant 3 : index
    %c0_52 = arith.constant 0 : index
    %c0_53 = arith.constant 0 : index
    %73 = vector.load %arg7[%c3_51, %c0_52, %c0_53] : memref<9x3x16xf32, #tpu.memory_space<vmem>>, vector<1x3x16xf32>
    %74 = vector.shape_cast %73 : vector<1x3x16xf32> to vector<3x16xf32>
    %75 = vector.extract_strided_slice %58 {offsets = [0, 18], sizes = [16, 384], strides = [1, 1]} : vector<16x512xf32> to vector<16x384xf32>
    %cst_54 = arith.constant dense<0.000000e+00> : vector<3x384xf32>
    %76 = tpu.matmul %74, %75, %cst_54 {dimension_numbers = #tpu.dot_dimension_numbers<[1], [0], [0], [1], [0, 0, 1, 1], [], []>} : vector<3x16xf32>, vector<16x384xf32>, vector<3x384xf32> -> vector<3x384xf32>
    %77 = arith.addf %72, %76 : vector<3x384xf32>
    %c4_55 = arith.constant 4 : index
    %c0_56 = arith.constant 0 : index
    %c0_57 = arith.constant 0 : index
    %78 = vector.load %arg7[%c4_55, %c0_56, %c0_57] : memref<9x3x16xf32, #tpu.memory_space<vmem>>, vector<1x3x16xf32>
    %79 = vector.shape_cast %78 : vector<1x3x16xf32> to vector<3x16xf32>
    %80 = vector.extract_strided_slice %58 {offsets = [0, 19], sizes = [16, 384], strides = [1, 1]} : vector<16x512xf32> to vector<16x384xf32>
    %cst_58 = arith.constant dense<0.000000e+00> : vector<3x384xf32>
    %81 = tpu.matmul %79, %80, %cst_58 {dimension_numbers = #tpu.dot_dimension_numbers<[1], [0], [0], [1], [0, 0, 1, 1], [], []>} : vector<3x16xf32>, vector<16x384xf32>, vector<3x384xf32> -> vector<3x384xf32>
    %82 = arith.addf %77, %81 : vector<3x384xf32>
    %c5_59 = arith.constant 5 : index
    %c0_60 = arith.constant 0 : index
    %c0_61 = arith.constant 0 : index
    %83 = vector.load %arg7[%c5_59, %c0_60, %c0_61] : memref<9x3x16xf32, #tpu.memory_space<vmem>>, vector<1x3x16xf32>
    %84 = vector.shape_cast %83 : vector<1x3x16xf32> to vector<3x16xf32>
    %85 = vector.extract_strided_slice %58 {offsets = [0, 20], sizes = [16, 384], strides = [1, 1]} : vector<16x512xf32> to vector<16x384xf32>
    %cst_62 = arith.constant dense<0.000000e+00> : vector<3x384xf32>
    %86 = tpu.matmul %84, %85, %cst_62 {dimension_numbers = #tpu.dot_dimension_numbers<[1], [0], [0], [1], [0, 0, 1, 1], [], []>} : vector<3x16xf32>, vector<16x384xf32>, vector<3x384xf32> -> vector<3x384xf32>
    %87 = arith.addf %82, %86 : vector<3x384xf32>
    %c6_63 = arith.constant 6 : index
    %c0_64 = arith.constant 0 : index
    %c0_65 = arith.constant 0 : index
    %88 = vector.load %arg7[%c6_63, %c0_64, %c0_65] : memref<9x3x16xf32, #tpu.memory_space<vmem>>, vector<1x3x16xf32>
    %89 = vector.shape_cast %88 : vector<1x3x16xf32> to vector<3x16xf32>
    %90 = vector.extract_strided_slice %58 {offsets = [0, 36], sizes = [16, 384], strides = [1, 1]} : vector<16x512xf32> to vector<16x384xf32>
    %cst_66 = arith.constant dense<0.000000e+00> : vector<3x384xf32>
    %91 = tpu.matmul %89, %90, %cst_66 {dimension_numbers = #tpu.dot_dimension_numbers<[1], [0], [0], [1], [0, 0, 1, 1], [], []>} : vector<3x16xf32>, vector<16x384xf32>, vector<3x384xf32> -> vector<3x384xf32>
    %92 = arith.addf %87, %91 : vector<3x384xf32>
    %c7_67 = arith.constant 7 : index
    %c0_68 = arith.constant 0 : index
    %c0_69 = arith.constant 0 : index
    %93 = vector.load %arg7[%c7_67, %c0_68, %c0_69] : memref<9x3x16xf32, #tpu.memory_space<vmem>>, vector<1x3x16xf32>
    %94 = vector.shape_cast %93 : vector<1x3x16xf32> to vector<3x16xf32>
    %95 = vector.extract_strided_slice %58 {offsets = [0, 37], sizes = [16, 384], strides = [1, 1]} : vector<16x512xf32> to vector<16x384xf32>
    %cst_70 = arith.constant dense<0.000000e+00> : vector<3x384xf32>
    %96 = tpu.matmul %94, %95, %cst_70 {dimension_numbers = #tpu.dot_dimension_numbers<[1], [0], [0], [1], [0, 0, 1, 1], [], []>} : vector<3x16xf32>, vector<16x384xf32>, vector<3x384xf32> -> vector<3x384xf32>
    %97 = arith.addf %92, %96 : vector<3x384xf32>
    %c8_71 = arith.constant 8 : index
    %c0_72 = arith.constant 0 : index
    %c0_73 = arith.constant 0 : index
    %98 = vector.load %arg7[%c8_71, %c0_72, %c0_73] : memref<9x3x16xf32, #tpu.memory_space<vmem>>, vector<1x3x16xf32>
    %99 = vector.shape_cast %98 : vector<1x3x16xf32> to vector<3x16xf32>
    %100 = vector.extract_strided_slice %58 {offsets = [0, 38], sizes = [16, 384], strides = [1, 1]} : vector<16x512xf32> to vector<16x384xf32>
    %cst_74 = arith.constant dense<0.000000e+00> : vector<3x384xf32>
    %101 = tpu.matmul %99, %100, %cst_74 {dimension_numbers = #tpu.dot_dimension_numbers<[1], [0], [0], [1], [0, 0, 1, 1], [], []>} : vector<3x16xf32>, vector<16x384xf32>, vector<3x384xf32> -> vector<3x384xf32>
    %102 = arith.addf %97, %101 : vector<3x384xf32>
    %c0_75 = arith.constant 0 : index
    %c0_76 = arith.constant 0 : index
    %103 = vector.load %arg8[%c0_75, %c0_76] : memref<3x1xf32, #tpu.memory_space<vmem>>, vector<3x1xf32>
    %104 = vector.broadcast %103 : vector<3x1xf32> to vector<3x384xf32>
    %105 = arith.addf %102, %104 : vector<3x384xf32>
    %106 = vector.extract_strided_slice %4 {offsets = [0, 19], sizes = [1, 384], strides = [1, 1]} : vector<1x512xf32> to vector<1x384xf32>
    %cst_77 = arith.constant 0.000000e+00 : f32
    %107 = vector.broadcast %cst_77 : f32 to vector<3x384xf32>
    %108 = arith.maximumf %105, %107 : vector<3x384xf32>
    %109 = arith.mulf %105, %3 : vector<3x384xf32>
    %110 = arith.subf %108, %109 : vector<3x384xf32>
    %111 = math.absf %105 : vector<3x384xf32>
    %cst_78 = arith.constant 0.000000e+00 : f32
    %112 = vector.broadcast %cst_78 : f32 to vector<3x384xf32>
    %113 = arith.subf %112, %111 : vector<3x384xf32>
    %114 = math.exp %113 : vector<3x384xf32>
    %cst_79 = arith.constant 1.000000e+00 : f32
    %115 = vector.broadcast %cst_79 : f32 to vector<3x384xf32>
    %116 = arith.addf %115, %114 : vector<3x384xf32>
    %117 = math.log %116 : vector<3x384xf32>
    %118 = arith.addf %110, %117 : vector<3x384xf32>
    %119 = vector.broadcast %106 : vector<1x384xf32> to vector<3x384xf32>
    %120 = arith.mulf %118, %119 : vector<3x384xf32>
    %121 = vector.shape_cast %120 : vector<3x384xf32> to vector<1x3x384xf32>
    %cst_80 = arith.constant dense<0.000000e+00> : vector<1xf32>
    %122 = vector.multi_reduction <add>, %121, %cst_80 [1, 2] : vector<1x3x384xf32> to vector<1xf32>
    %123 = vector.shape_cast %122 : vector<1xf32> to vector<1x1x1xf32>
    %124 = vector.extract %123[0, 0, 0] : f32 from vector<1x1x1xf32>
    %125 = vector.broadcast %124 : f32 to vector<1x1x1xf32>
    %c0_81 = arith.constant 0 : index
    %c0_82 = arith.constant 0 : index
    %c0_83 = arith.constant 0 : index
    %126 = vector.load %arg9[%c0_81, %c0_82, %c0_83] : memref<1x1x1xf32, #tpu.memory_space<vmem>>, vector<1x1x1xf32>
    tpu.vector_store %arg9[%c0_81, %c0_82, %c0_83], %125 {strides = array<i32>} : memref<1x1x1xf32, #tpu.memory_space<vmem>>, vector<1x1x1xf32>,
    return
  }
  func.func @transform_0(%arg0: i32) -> (i32, i32, i32) {
    %c0_i32 = arith.constant 0 : i32
    %c0_i32_0 = arith.constant 0 : i32
    %c0_i32_1 = arith.constant 0 : i32
    return %arg0, %c0_i32, %c0_i32_0 : i32, i32, i32
  }
  func.func @transform_1(%arg0: i32) -> (i32, i32, i32) {
    %c0_i32 = arith.constant 0 : i32
    %c0_i32_0 = arith.constant 0 : i32
    %c0_i32_1 = arith.constant 0 : i32
    return %arg0, %c0_i32, %c0_i32_0 : i32, i32, i32
  }
  func.func @transform_2(%arg0: i32) -> (i32, i32) {
    %c0_i32 = arith.constant 0 : i32
    %c0_i32_0 = arith.constant 0 : i32
    %c0_i32_1 = arith.constant 0 : i32
    return %c0_i32, %c0_i32_0 : i32, i32
  }
  func.func @transform_3(%arg0: i32) -> (i32, i32, i32) {
    %c0_i32 = arith.constant 0 : i32
    %c0_i32_0 = arith.constant 0 : i32
    %c0_i32_1 = arith.constant 0 : i32
    %c0_i32_2 = arith.constant 0 : i32
    return %c0_i32, %c0_i32_0, %c0_i32_1 : i32, i32, i32
  }
  func.func @transform_4(%arg0: i32) -> (i32, i32) {
    %c0_i32 = arith.constant 0 : i32
    %c0_i32_0 = arith.constant 0 : i32
    %c0_i32_1 = arith.constant 0 : i32
    return %c0_i32, %c0_i32_0 : i32, i32
  }
  func.func @transform_5(%arg0: i32) -> (i32, i32) {
    %c0_i32 = arith.constant 0 : i32
    %c0_i32_0 = arith.constant 0 : i32
    %c0_i32_1 = arith.constant 0 : i32
    return %c0_i32, %c0_i32_0 : i32, i32
  }
  func.func @transform_6(%arg0: i32) -> (i32, i32, i32) {
    %c0_i32 = arith.constant 0 : i32
    %c0_i32_0 = arith.constant 0 : i32
    %c0_i32_1 = arith.constant 0 : i32
    %c0_i32_2 = arith.constant 0 : i32
    return %c0_i32, %c0_i32_0, %c0_i32_1 : i32, i32, i32
  }
  func.func @transform_7(%arg0: i32) -> (i32, i32) {
    %c0_i32 = arith.constant 0 : i32
    %c0_i32_0 = arith.constant 0 : i32
    %c0_i32_1 = arith.constant 0 : i32
    return %c0_i32, %c0_i32_0 : i32, i32
  }
  func.func @transform_8(%arg0: i32) -> (i32, i32, i32) {
    %c0_i32 = arith.constant 0 : i32
    %c0_i32_0 = arith.constant 0 : i32
    %c0_i32_1 = arith.constant 0 : i32
    return %arg0, %c0_i32, %c0_i32_0 : i32, i32, i32
  }
}

</mosaic_0001>

<bundles_post_ra>
// kernel: tpu_custom_call.1
= control target key start
LH: loop header
LB: loop body
LE: loop exit
PB: predicated region body
PF: predicated region fallthrough
CT: control target
= control target key end

     0   :  { %s4149_s27 = smov 0   ;;  %s4920_s0 = inlined_call_operand.vmem [shape: f32[2,4,640], index: 0, kind: input, shape index: {}]   ;;  %s4921_s1 = inlined_call_operand.vmem [shape: f32[2,3,384], index: 1, kind: input, shape index: {}]   ;;  %s4922_s2 = inlined_call_operand.vmem [shape: f32[1,512], index: 2, kind: input, shape index: {}]   ;;  %s4923_s3 = inlined_call_operand.vmem [shape: f32[9,16,4], index: 3, kind: input, shape index: {}]   ;;  %s4924_s4 = inlined_call_operand.vmem [shape: f32[16,1], index: 4, kind: input, shape index: {}]   ;;  %s4925_s5 = inlined_call_operand.vmem [shape: f32[16,1], index: 5, kind: input, shape index: {}]   ;;  %s4926_s6 = inlined_call_operand.vmem [shape: f32[9,3,16], index: 6, kind: input, shape index: {}]   ;;  %s4927_s7 = inlined_call_operand.vmem [shape: f32[3,1], index: 7, kind: input, shape index: {}]   ;;  %s4928_s8 = inlined_call_operand.vmem [shape: f32[2,1,1], index: 8, kind: output, shape index: {}]  }
   0x1 LB: > { %s3832_s28 = sadd.s32 4294967295, %s4091_s27   ;;  %p3836_p0 = scmp.ge.s32.totalorder %s4091_s27, 1  ;;  %s4091_s27 = sphi %s4149_s27, %s18_s27  }
   0x2   : > { %p272_p1 = scmp.lt.s32.totalorder %s4091_s27, 3 }
   0x4   : > { %p273_p2 = pnand %p3836_p0, %p272_p1 }
   0x5   : > { %p309_p3 = scmp.lt.s32.totalorder (!%p273_p2), %s3832_s28, 1  ;;  %s4094_s11 = smov (!%p273_p2), 127  }
   0x6   : > { %276 = sbr.rel (%p273_p2) target bundleno = 1100 (0x44c), region = 52  ;;  %s4095_s12 = smov (!%p273_p2), 126  }
   0x7   : > { %s4096_s13 = smov (!%p273_p2), 110   ;;  %s4097_s14 = smov (!%p273_p2), 109  }
   0x8   : > { %s4098_s15 = smov (!%p273_p2), 108   ;;  %s4099_s16 = smov (!%p273_p2), 92  }
   0x9   : > { %s4100_s17 = smov (!%p273_p2), 91   ;;  %s4101_s18 = smov (!%p273_p2), 90  }
   0xb   : > { %v4093_v0 = vmov 0.0   ;;  %s4930_s28 = smov (!%p309_p3, %s3832_s28), 1  ;;  %v4102_v6 = vmov 0   ;;  %v2050_v7 = vld [vmem:[%s4924_s4 + $0x8] sm:$0xff]  ;;  %v2049_v8 = vld [vmem:[%s4924_s4] sm:$0xff]  ;;  %vm348_vm0 = vcmask 1039360  }
   0xc   : > { %510 = vmatprep.mubr.f32.mxu1 %v4093_v0  ;;  %433 = vmatprep.mubr.f32.mxu0 %v4093_v0  ;;  %s4045_s29 = smul.u32 20, %s4930_s28  ;;  %v2069_v9 = vld [vmem:[%s4925_s5] sm:$0xff]  ;;  %v2070_v10 = vld [vmem:[%s4925_s5 + $0x8] sm:$0xff]  ;;  %vm360_vm1 = vcmask 1043456   ;;  %v3839_v17 = vld [vmem:[%s4923_s3 + $0x10] sm:$0xff]  ;;  %vm353_vm2 = vcmask 31744  }
   0xd   : > { %4068 = vset.pattern.permute.xlu0 %v4102_v6  ;;  %4069 = vset.pattern.permute.xlu1 %v4102_v6  ;;  %v3840_v22 = vld [vmem:[%s4923_s3 + $0x18] sm:$0xff]  ;;  %vm704_vm3 = vcmask 1031168   ;;  %v328_v26 = vld [vmem:[%s4923_s3] sm:$0xff]  ;;  %v329_v31 = vld [vmem:[%s4923_s3 + $0x8] sm:$0xff]  ;;  %vm898_vm4 = vcmask 900096   ;;  %vm1092_vm5 = vcmask 891904  }
   0xe   : > { %s313_s10 = scalar_lea.vmem %s4920_s0, %s4045_s29  ;;  %v3857_v36 = vld [vmem:[%s4923_s3 + $0x20] sm:$0xff]  ;;  %v3858_v39 = vld [vmem:[%s4923_s3 + $0x28] sm:$0xff]  ;;  %v3867_v44 = vld [vmem:[%s4923_s3 + $0x30] sm:$0xff]  ;;  %vm1286_vm6 = vcmask 883712   ;;  %vm1480_vm7 = vcmask 752640   ;;  %vm1674_vm8 = vcmask 744448  }
   0xf   : > { %v4165_v1 = vld [vmem:[%s313_s10 + $0x8] sm:$0xff]  ;;  %v4167_v2 = vld [vmem:[%s313_s10] sm:$0xff]  ;;  %v324_v4 = vld [vmem:[%s313_s10 + $0x10] sm:$0xf]  ;;  %vm1868_vm9 = vcmask 736256   ;;  %vm4103_vm10 = vmmov 0  }
  0x10   : > { %342 = vrot.lane.b32.xlu0 %v4165_v1, %s4094_s11  ;;  %338 = vrot.lane.b32.xlu1 %v4167_v2, %s4094_s11  ;;  %v4175_v3 = vcombine.high %v4165_v1, %v4165_v1  ;;  %v4182_v5 = vcombine.high %v4167_v2, %v4167_v2  ;;  %v3868_v49 = vld [vmem:[%s4923_s3 + $0x38] sm:$0xff]  ;;  %v3877_v55 = vld [vmem:[%s4923_s3 + $0x40] sm:$0xff]  ;;  %vm2165_vm11 = vcmask 130048   ;;  %vm3755_vm12 = vcmask 1042432  }
  0x11   : > { %v3878_v59 = vld [vmem:[%s4923_s3 + $0x48] sm:$0xff]  ;;  %vm3771_vm13 = vcmask 0  }
  0x14   : > { %346 = vrot.lane.b32.xlu0 %v324_v4, %s4094_s11  ;;  %344 = vrot.lane.b32.xlu1 %v4175_v3, %s4094_s11 }
  0x18   : > { %696 = vrot.lane.b32.xlu1 %v4182_v5, %s4095_s12  ;;  %340 = vrot.lane.b32.xlu0 %v4182_v5, %s4094_s11 }
  0x1c   : > { %694 = vrot.lane.b32.xlu1 %v4167_v2, %s4095_s12  ;;  %698 = vrot.lane.b32.xlu0 %v4165_v1, %s4095_s12 }
  0x20   : > { %702 = vrot.lane.b32.xlu1 %v324_v4, %s4095_s12  ;;  %700 = vrot.lane.b32.xlu0 %v4175_v3, %s4095_s12 }
  0x24   : > { %892 = vrot.lane.b32.xlu1 %v4165_v1, %s4096_s13  ;;  %890 = vrot.lane.b32.xlu0 %v4182_v5, %s4096_s13 }
  0x28   : > { %894 = vrot.lane.b32.xlu1 %v4175_v3, %s4096_s13  ;;  %888 = vrot.lane.b32.xlu0 %v4167_v2, %s4096_s13 }
  0x2c   : > { %1084 = vrot.lane.b32.xlu1 %v4182_v5, %s4097_s14  ;;  %896 = vrot.lane.b32.xlu0 %v324_v4, %s4096_s13 }
  0x30   : > { %1082 = vrot.lane.b32.xlu1 %v4167_v2, %s4097_s14  ;;  %1086 = vrot.lane.b32.xlu0 %v4165_v1, %s4097_s14 }
  0x34   : > { %1090 = vrot.lane.b32.xlu1 %v324_v4, %s4097_s14  ;;  %1088 = vrot.lane.b32.xlu0 %v4175_v3, %s4097_s14 }
  0x38   : > { %1280 = vrot.lane.b32.xlu1 %v4165_v1, %s4098_s15  ;;  %1278 = vrot.lane.b32.xlu0 %v4182_v5, %s4098_s15 }
  0x3c   : > { %1282 = vrot.lane.b32.xlu1 %v4175_v3, %s4098_s15  ;;  %1276 = vrot.lane.b32.xlu0 %v4167_v2, %s4098_s15 }
  0x40   : > { %1472 = vrot.lane.b32.xlu1 %v4182_v5, %s4099_s16  ;;  %1284 = vrot.lane.b32.xlu0 %v324_v4, %s4098_s15 }
  0x44   : > { %1470 = vrot.lane.b32.xlu1 %v4167_v2, %s4099_s16  ;;  %1474 = vrot.lane.b32.xlu0 %v4165_v1, %s4099_s16 }
  0x48   : > { %1478 = vrot.lane.b32.xlu1 %v324_v4, %s4099_s16  ;;  %1476 = vrot.lane.b32.xlu0 %v4175_v3, %s4099_s16 }
  0x4c   : > { %1668 = vrot.lane.b32.xlu1 %v4165_v1, %s4100_s17  ;;  %1666 = vrot.lane.b32.xlu0 %v4182_v5, %s4100_s17 }
  0x50   : > { %1670 = vrot.lane.b32.xlu1 %v4175_v3, %s4100_s17  ;;  %1664 = vrot.lane.b32.xlu0 %v4167_v2, %s4100_s17 }
  0x54   : > { %1860 = vrot.lane.b32.xlu1 %v4182_v5, %s4101_s18  ;;  %1672 = vrot.lane.b32.xlu0 %v324_v4, %s4100_s17 }
  0x58   : > { %1858 = vrot.lane.b32.xlu1 %v4167_v2, %s4101_s18  ;;  %1862 = vrot.lane.b32.xlu0 %v4165_v1, %s4101_s18 }
  0x5c   : > { %1866 = vrot.lane.b32.xlu1 %v324_v4, %s4101_s18  ;;  %1864 = vrot.lane.b32.xlu0 %v4175_v3, %s4101_s18 }
  0x60   : > { %2058 = vperm.xlu0 %4068, %v2050_v7   ;;  %2053 = vperm.xlu1 %4069, %v2049_v8  }
  0x64   : > { %2073 = vperm.xlu0 %4068, %v2069_v9   ;;  %2078 = vperm.xlu1 %4069, %v2070_v10   ;;  %v3888_v9 = vld [vmem:[%s4923_s3 + $0x58] sm:$0xff] }
  0x82   : > { %v343_v11 = vpop.permute.xlu0 %342  ;;  %v339_v12 = vpop.permute.xlu1 %338 }
  0x86   : > { %v347_v13 = vpop.permute.xlu0 %346  ;;  %v345_v14 = vpop.permute.xlu1 %344 }
  0x87   : > { %v352_v15 = vsel %vm348_vm0, %v345_v14, %v347_v13  ;;  %v351_v16 = vsel %vm348_vm0, %v343_v11, %v345_v14  ;;  %v3897_v14 = vld [vmem:[%s4923_s3 + $0x60] sm:$0xff] }
  0x88   : > { %3845 = vmatprep.subr.msk.mxu1 %vm360_vm1, %v352_v15 }
  0x89   : > { %3846 = vmatpush1.msk.msra.mxu1 %vm360_vm1, %v351_v16 }
  0x8a   : > { %3847 = vmatmul.mubr.msk.f32.vlgmr.msra.gmra.mxu1 %vm353_vm2, %v3839_v17  ;;  %v697_v18 = vpop.permute.xlu1 %696  ;;  %v341_v19 = vpop.permute.xlu0 %340  ;;  %3853 = vmatprep.subr.msk.mxu1 %vm360_vm1, %v4175_v3  ;;  %v3887_v3 = vld [vmem:[%s4923_s3 + $0x50] sm:$0xff] }
  0x8b   : > { %v350_v20 = vsel %vm348_vm0, %v341_v19, %v343_v11  ;;  %v349_v21 = vsel %vm348_vm0, %v339_v12, %v341_v19  ;;  %516 = vmatprep.mubr.f32.mxu1 %v4093_v0  ;;  %3854 = vmatpush1.msk.msra.mxu1 %vm360_vm1, %v4165_v1 }
  0x8c   : > { %3841 = vmatprep.subr.msk.mxu0 %vm360_vm1, %v350_v20 }
  0x8d   : > { %3842 = vmatpush1.msk.msra.mxu0 %vm360_vm1, %v349_v21 }
  0x8e   : > { %3848 = vmatmul.mubr.msk.f32.gmra.mxu1 %vm353_vm2, %v3840_v22  ;;  %v695_v23 = vpop.permute.xlu1 %694  ;;  %3843 = vmatmul.mubr.msk.f32.vlgmr.msra.gmra.mxu0 %vm353_vm2, %v3839_v17  ;;  %v699_v24 = vpop.permute.xlu0 %698 }
  0x8f   : > { %3849 = vmatprep.subr.msk.mxu0 %vm360_vm1, %v4182_v5  ;;  %v706_v25 = vsel %vm704_vm3, %v697_v18, %v699_v24  ;;  %439 = vmatprep.mubr.f32.mxu0 %v4093_v0  ;;  %v705_v32 = vsel %vm704_vm3, %v695_v23, %v697_v18  ;;  %v3898_v18 = vld [vmem:[%s4923_s3 + $0x68] sm:$0xff] }
  0x90   : > { %3850 = vmatpush1.msk.msra.mxu0 %vm360_vm1, %v4167_v2  ;;  %678 = vmatprep.mubr.f32.mxu1 %v4093_v0 }
  0x91   : > { %3859 = vmatprep.subr.msk.mxu0 %vm360_vm1, %v706_v25 }
  0x92   : > { %3855 = vmatmul.mubr.msk.f32.vlgmr.msra.gmra.mxu1 %vm353_vm2, %v328_v26  ;;  %v703_v27 = vpop.permute.xlu1 %702  ;;  %3844 = vmatmul.mubr.msk.f32.gmra.mxu0 %vm353_vm2, %v3840_v22  ;;  %v701_v28 = vpop.permute.xlu0 %700  ;;  %v3907_v22 = vld [vmem:[%s4923_s3 + $0x70] sm:$0xff] }
  0x93   : > { %v707_v29 = vsel %vm704_vm3, %v699_v24, %v701_v28  ;;  %v708_v30 = vsel %vm704_vm3, %v701_v28, %v703_v27  ;;  %601 = vmatprep.mubr.f32.mxu0 %v4093_v0  ;;  %684 = vmatprep.mubr.f32.mxu1 %v4093_v0 }
  0x94   : > { %3863 = vmatprep.subr.msk.mxu1 %vm360_vm1, %v708_v30 }
  0x95   : > { %3864 = vmatpush1.msk.msra.mxu1 %vm360_vm1, %v707_v29 }
  0x96   : > { %3856 = vmatmul.mubr.msk.f32.gmra.mxu1 %vm353_vm2, %v329_v31  ;;  %v893_v33 = vpop.permute.xlu1 %892  ;;  %3851 = vmatmul.mubr.msk.f32.vlgmr.msra.gmra.mxu0 %vm353_vm2, %v328_v26  ;;  %v891_v34 = vpop.permute.xlu0 %890  ;;  %v3908_v26 = vld [vmem:[%s4923_s3 + $0x78] sm:$0xff] }
  0x97   : > { %3860 = vmatpush1.msk.msra.mxu0 %vm360_vm1, %v705_v32  ;;  %v900_v35 = vsel %vm898_vm4, %v891_v34, %v893_v33  ;;  %607 = vmatprep.mubr.f32.mxu0 %v4093_v0  ;;  %v3917_v32 = vld [vmem:[%s4923_s3 + $0x80] sm:$0xff] }
  0x98   : > { %3869 = vmatprep.subr.msk.mxu0 %vm360_vm1, %v900_v35  ;;  %864 = vmatprep.mubr.f32.mxu1 %v4093_v0 }
  0x9a   : > { %v895_v37 = vpop.permute.xlu1 %894  ;;  %3852 = vmatmul.mubr.msk.f32.gmra.mxu0 %vm353_vm2, %v329_v31  ;;  %3865 = vmatmul.mubr.msk.f32.vlgmr.msra.gmra.mxu1 %vm353_vm2, %v3857_v36  ;;  %v889_v38 = vpop.permute.xlu0 %888 }
  0x9b   : > { %787 = vmatprep.mubr.f32.mxu0 %v4093_v0  ;;  %870 = vmatprep.mubr.f32.mxu1 %v4093_v0  ;;  %v899_v40 = vsel %vm898_vm4, %v889_v38, %v891_v34  ;;  %v901_v45 = vsel %vm898_vm4, %v893_v33, %v895_v37 }
  0x9e   : > { %v1085_v41 = vpop.permute.xlu1 %1084  ;;  %3861 = vmatmul.mubr.msk.f32.vlgmr.msra.gmra.mxu0 %vm353_vm2, %v3857_v36  ;;  %3866 = vmatmul.mubr.msk.f32.gmra.mxu1 %vm353_vm2, %v3858_v39  ;;  %v897_v42 = vpop.permute.xlu0 %896 }
  0x9f   : > { %3870 = vmatpush1.msk.msra.mxu0 %vm360_vm1, %v899_v40  ;;  %v902_v43 = vsel %vm898_vm4, %v895_v37, %v897_v42  ;;  %793 = vmatprep.mubr.f32.mxu0 %v4093_v0  ;;  %v3918_v37 = vld [vmem:[%s4923_s3 + $0x88] sm:$0xff] }
  0xa0   : > { %3873 = vmatprep.subr.msk.mxu1 %vm360_vm1, %v902_v43  ;;  %1058 = vmatprep.mubr.f32.mxu1 %v4093_v0 }
  0xa1   : > { %3874 = vmatpush1.msk.msra.mxu1 %vm360_vm1, %v901_v45 }
  0xa2   : > { %v1083_v46 = vpop.permute.xlu1 %1082  ;;  %3862 = vmatmul.mubr.msk.f32.gmra.mxu0 %vm353_vm2, %v3858_v39  ;;  %3875 = vmatmul.mubr.msk.f32.vlgmr.msra.gmra.mxu1 %vm353_vm2, %v3867_v44  ;;  %v1087_v47 = vpop.permute.xlu0 %1086 }
  0xa3   : > { %v1094_v48 = vsel %vm1092_vm5, %v1085_v41, %v1087_v47  ;;  %981 = vmatprep.mubr.f32.mxu0 %v4093_v0  ;;  %1064 = vmatprep.mubr.f32.mxu1 %v4093_v0  ;;  %v1093_v50 = vsel %vm1092_vm5, %v1083_v46, %v1085_v41 }
  0xa4   : > { %3879 = vmatprep.subr.msk.mxu0 %vm360_vm1, %v1094_v48 }
  0xa6   : > { %v1091_v51 = vpop.permute.xlu1 %1090  ;;  %3871 = vmatmul.mubr.msk.f32.vlgmr.msra.gmra.mxu0 %vm353_vm2, %v3867_v44  ;;  %3876 = vmatmul.mubr.msk.f32.gmra.mxu1 %vm353_vm2, %v3868_v49  ;;  %v1089_v52 = vpop.permute.xlu0 %1088 }
  0xa7   : > { %3880 = vmatpush1.msk.msra.mxu0 %vm360_vm1, %v1093_v50  ;;  %v1095_v53 = vsel %vm1092_vm5, %v1087_v47, %v1089_v52  ;;  %v1096_v54 = vsel %vm1092_vm5, %v1089_v52, %v1091_v51  ;;  %987 = vmatprep.mubr.f32.mxu0 %v4093_v0 }
  0xa8   : > { %3883 = vmatprep.subr.msk.mxu1 %vm360_vm1, %v1096_v54  ;;  %1252 = vmatprep.mubr.f32.mxu1 %v4093_v0 }
  0xa9   : > { %3884 = vmatpush1.msk.msra.mxu1 %vm360_vm1, %v1095_v53 }
  0xaa   : > { %v1281_v56 = vpop.permute.xlu1 %1280  ;;  %3872 = vmatmul.mubr.msk.f32.gmra.mxu0 %vm353_vm2, %v3868_v49  ;;  %3885 = vmatmul.mubr.msk.f32.vlgmr.msra.gmra.mxu1 %vm353_vm2, %v3877_v55  ;;  %v1279_v57 = vpop.permute.xlu0 %1278 }
  0xab   : > { %v1288_v58 = vsel %vm1286_vm6, %v1279_v57, %v1281_v56  ;;  %1175 = vmatprep.mubr.f32.mxu0 %v4093_v0  ;;  %1258 = vmatprep.mubr.f32.mxu1 %v4093_v0 }
  0xac   : > { %3889 = vmatprep.subr.msk.mxu0 %vm360_vm1, %v1288_v58 }
  0xae   : > { %v1283_v60 = vpop.permute.xlu1 %1282  ;;  %3881 = vmatmul.mubr.msk.f32.vlgmr.msra.gmra.mxu0 %vm353_vm2, %v3877_v55  ;;  %3886 = vmatmul.mubr.msk.f32.gmra.mxu1 %vm353_vm2, %v3878_v59  ;;  %v1277_v61 = vpop.permute.xlu0 %1276 }
  0xaf   : > { %v1287_v62 = vsel %vm1286_vm6, %v1277_v61, %v1279_v57  ;;  %1181 = vmatprep.mubr.f32.mxu0 %v4093_v0  ;;  %1446 = vmatprep.mubr.f32.mxu1 %v4093_v0  ;;  %v1289_v4 = vsel %vm1286_vm6, %v1281_v56, %v1283_v60 }
  0xb0   : > { %3890 = vmatpush1.msk.msra.mxu0 %vm360_vm1, %v1287_v62 }
  0xb2   : > { %v1473_v63 = vpop.permute.xlu1 %1472  ;;  %3882 = vmatmul.mubr.msk.f32.gmra.mxu0 %vm353_vm2, %v3878_v59  ;;  %v1285_v1 = vpop.permute.xlu0 %1284 }
  0xb3   : > { %v1290_v2 = vsel %vm1286_vm6, %v1283_v60, %v1285_v1  ;;  %1369 = vmatprep.mubr.f32.mxu0 %v4093_v0 }
  0xb4   : > { %3893 = vmatprep.subr.msk.mxu1 %vm360_vm1, %v1290_v2 }
  0xb5   : > { %3894 = vmatpush1.msk.msra.mxu1 %vm360_vm1, %v1289_v4 }
  0xb6   : > { %v1471_v5 = vpop.permute.xlu1 %1470  ;;  %3891 = vmatmul.mubr.msk.f32.vlgmr.msra.gmra.mxu0 %vm353_vm2, %v3887_v3  ;;  %3895 = vmatmul.mubr.msk.f32.vlgmr.msra.gmra.mxu1 %vm353_vm2, %v3887_v3  ;;  %v1475_v6 = vpop.permute.xlu0 %1474 }
  0xb7   : > { %v1481_v7 = vsel %vm1480_vm7, %v1471_v5, %v1473_v63  ;;  %v1482_v8 = vsel %vm1480_vm7, %v1473_v63, %v1475_v6  ;;  %1375 = vmatprep.mubr.f32.mxu0 %v4093_v0  ;;  %1452 = vmatprep.mubr.f32.mxu1 %v4093_v0 }
  0xb8   : > { %3899 = vmatprep.subr.msk.mxu0 %vm360_vm1, %v1482_v8 }
  0xb9   : > { %3900 = vmatpush1.msk.msra.mxu0 %vm360_vm1, %v1481_v7 }
  0xba   : > { %v1479_v10 = vpop.permute.xlu1 %1478  ;;  %3892 = vmatmul.mubr.msk.f32.gmra.mxu0 %vm353_vm2, %v3888_v9  ;;  %3896 = vmatmul.mubr.msk.f32.gmra.mxu1 %vm353_vm2, %v3888_v9  ;;  %v1477_v11 = vpop.permute.xlu0 %1476 }
  0xbb   : > { %v1483_v12 = vsel %vm1480_vm7, %v1475_v6, %v1477_v11  ;;  %v1484_v13 = vsel %vm1480_vm7, %v1477_v11, %v1479_v10  ;;  %1563 = vmatprep.mubr.f32.mxu0 %v4093_v0  ;;  %1640 = vmatprep.mubr.f32.mxu1 %v4093_v0 }
  0xbc   : > { %3903 = vmatprep.subr.msk.mxu1 %vm360_vm1, %v1484_v13 }
  0xbd   : > { %3904 = vmatpush1.msk.msra.mxu1 %vm360_vm1, %v1483_v12 }
  0xbe   : > { %v1669_v15 = vpop.permute.xlu1 %1668  ;;  %3901 = vmatmul.mubr.msk.f32.vlgmr.msra.gmra.mxu0 %vm353_vm2, %v3897_v14  ;;  %3905 = vmatmul.mubr.msk.f32.vlgmr.msra.gmra.mxu1 %vm353_vm2, %v3897_v14  ;;  %v1667_v16 = vpop.permute.xlu0 %1666 }
  0xbf   : > { %v1676_v17 = vsel %vm1674_vm8, %v1667_v16, %v1669_v15  ;;  %1569 = vmatprep.mubr.f32.mxu0 %v4093_v0  ;;  %1646 = vmatprep.mubr.f32.mxu1 %v4093_v0 }
  0xc0   : > { %3909 = vmatprep.subr.msk.mxu0 %vm360_vm1, %v1676_v17 }
  0xc2   : > { %v1671_v19 = vpop.permute.xlu1 %1670  ;;  %3902 = vmatmul.mubr.msk.f32.gmra.mxu0 %vm353_vm2, %v3898_v18  ;;  %3906 = vmatmul.mubr.msk.f32.gmra.mxu1 %vm353_vm2, %v3898_v18  ;;  %v1665_v20 = vpop.permute.xlu0 %1664 }
  0xc3   : > { %v1675_v21 = vsel %vm1674_vm8, %v1665_v20, %v1667_v16  ;;  %1757 = vmatprep.mubr.f32.mxu0 %v4093_v0  ;;  %1834 = vmatprep.mubr.f32.mxu1 %v4093_v0  ;;  %v1677_v27 = vsel %vm1674_vm8, %v1669_v15, %v1671_v19 }
  0xc4   : > { %3910 = vmatpush1.msk.msra.mxu0 %vm360_vm1, %v1675_v21 }
  0xc6   : > { %v1861_v23 = vpop.permute.xlu1 %1860  ;;  %3911 = vmatmul.mubr.msk.f32.vlgmr.msra.gmra.mxu0 %vm353_vm2, %v3907_v22  ;;  %v1673_v24 = vpop.permute.xlu0 %1672 }
  0xc7   : > { %v1678_v25 = vsel %vm1674_vm8, %v1671_v19, %v1673_v24  ;;  %1763 = vmatprep.mubr.f32.mxu0 %v4093_v0 }
  0xc8   : > { %3913 = vmatprep.subr.msk.mxu1 %vm360_vm1, %v1678_v25 }
  0xc9   : > { %3914 = vmatpush1.msk.msra.mxu1 %vm360_vm1, %v1677_v27 }
  0xca   : > { %v1859_v28 = vpop.permute.xlu1 %1858  ;;  %3912 = vmatmul.mubr.msk.f32.gmra.mxu0 %vm353_vm2, %v3908_v26  ;;  %3915 = vmatmul.mubr.msk.f32.vlgmr.msra.gmra.mxu1 %vm353_vm2, %v3907_v22  ;;  %v1863_v29 = vpop.permute.xlu0 %1862 }
  0xcb   : > { %v1869_v30 = vsel %vm1868_vm9, %v1859_v28, %v1861_v23  ;;  %v1870_v31 = vsel %vm1868_vm9, %v1861_v23, %v1863_v29  ;;  %1840 = vmatprep.mubr.f32.mxu1 %v4093_v0  ;;  %1951 = vmatprep.mubr.f32.mxu0 %v4093_v0 }
  0xcc   : > { %3919 = vmatprep.subr.msk.mxu0 %vm360_vm1, %v1870_v31 }
  0xcd   : > { %3920 = vmatpush1.msk.msra.mxu0 %vm360_vm1, %v1869_v30 }
  0xce   : > { %v1867_v33 = vpop.permute.xlu1 %1866  ;;  %3916 = vmatmul.mubr.msk.f32.gmra.mxu1 %vm353_vm2, %v3908_v26  ;;  %3921 = vmatmul.mubr.msk.f32.vlgmr.msra.gmra.mxu0 %vm353_vm2, %v3917_v32  ;;  %v1865_v34 = vpop.permute.xlu0 %1864 }
  0xcf   : > { %v1871_v35 = vsel %vm1868_vm9, %v1863_v29, %v1865_v34  ;;  %v1872_v36 = vsel %vm1868_vm9, %v1865_v34, %v1867_v33  ;;  %1957 = vmatprep.mubr.f32.mxu0 %v4093_v0  ;;  %2028 = vmatprep.mubr.f32.mxu1 %v4093_v0 }
  0xd0   : > { %3923 = vmatprep.subr.msk.mxu1 %vm360_vm1, %v1872_v36 }
  0xd1   : > { %3924 = vmatpush1.msk.msra.mxu1 %vm360_vm1, %v1871_v35 }
  0xd2   : > { %3922 = vmatmul.mubr.msk.f32.gmra.mxu0 %vm353_vm2, %v3918_v37  ;;  %3925 = vmatmul.mubr.msk.f32.vlgmr.msra.gmra.mxu1 %vm353_vm2, %v3917_v32 }
  0xd3   : > { %2034 = vmatprep.mubr.f32.mxu1 %v4093_v0  ;;  %3982 = vmatprep.subr.mxu1 %v4093_v0 }
  0xd4   : > { %2233 = vmatprep.mubr.f32.mxu0 %v4093_v0 }
  0xd6   : > { %3926 = vmatmul.mubr.msk.f32.gmra.mxu1 %vm353_vm2, %v3918_v37 }
  0xd7   : > { %3986 = vmatprep.mubr.msk.f32.mxu1 %vm4103_vm10, %v4093_v0 }
 0x14a   : > { %v4459_v38 = vpop.f32.mrf.mxu1 }
 0x14c   : > { %v4461_v39 = vpop.f32.mrf.mxu1 }
 0x14e   : > { %v4463_v40 = vpop.f32.mrf.mxu0  ;;  %v518_v41 = vpop.f32.mrf.mxu1 }
 0x150   : > { %v4465_v42 = vpop.f32.mrf.mxu0  ;;  %v520_v43 = vpop.f32.mrf.mxu1 }
 0x152   : > { %v441_v44 = vpop.f32.mrf.mxu0  ;;  %v4467_v45 = vpop.f32.mrf.mxu1 }
 0x154   : > { %v443_v46 = vpop.f32.mrf.mxu0  ;;  %v4469_v47 = vpop.f32.mrf.mxu1 }
 0x156   : > { %v603_v48 = vpop.f32.mrf.mxu0  ;;  %v686_v49 = vpop.f32.mrf.mxu1 }
 0x157   : > { %v687_v50 = vadd.f32 %v686_v49, %v518_v41 }
 0x158   : > { %v4471_v51 = vpop.f32.mrf.mxu0  ;;  %v688_v52 = vpop.f32.mrf.mxu1 }
 0x159   : > { %v689_v53 = vadd.f32 %v688_v52, %v520_v43 }
 0x15a   : > { %v609_v54 = vpop.f32.mrf.mxu0  ;;  %v4473_v55 = vpop.f32.mrf.mxu1 }
 0x15b   : > { %v610_v56 = vadd.f32 %v609_v54, %v441_v44 }
 0x15c   : > { %v611_v57 = vpop.f32.mrf.mxu0  ;;  %v4475_v58 = vpop.f32.mrf.mxu1 }
 0x15d   : > { %v612_v59 = vadd.f32 %v611_v57, %v443_v46 }
 0x15e   : > { %v789_v60 = vpop.f32.mrf.mxu0  ;;  %v872_v61 = vpop.f32.mrf.mxu1 }
 0x15f   : > { %v883_v62 = vadd.f32 %v872_v61, %v687_v50 }
 0x160   : > { %v4477_v63 = vpop.f32.mrf.mxu0  ;;  %v874_v1 = vpop.f32.mrf.mxu1 }
 0x161   : > { %v884_v2 = vadd.f32 %v874_v1, %v689_v53 }
 0x162   : > { %v795_v3 = vpop.f32.mrf.mxu0  ;;  %v4479_v4 = vpop.f32.mrf.mxu1 }
 0x163   : > { %v881_v5 = vadd.f32 %v795_v3, %v610_v56  ;;  %v604_v56 = vadd.f32 %v603_v48, %v4463_v40  ;;  %v2098_v40 = vlaneseq }
 0x164   : > { %v797_v6 = vpop.f32.mrf.mxu0  ;;  %v4481_v7 = vpop.f32.mrf.mxu1 }
 0x165   : > { %v882_v8 = vadd.f32 %v797_v6, %v612_v59  ;;  %v877_v61 = vadd.f32 %v789_v60, %v604_v56  ;;  %v606_v6 = vadd.f32 %v4471_v51, %v4465_v42 }
 0x166   : > { %v983_v9 = vpop.f32.mrf.mxu0  ;;  %v1066_v10 = vpop.f32.mrf.mxu1 }
 0x167   : > { %v1077_v11 = vadd.f32 %v1066_v10, %v883_v62  ;;  %v878_v60 = vadd.f32 %v4477_v63, %v606_v6 }
 0x168   : > { %v985_v12 = vpop.f32.mrf.mxu0  ;;  %v1068_v13 = vpop.f32.mrf.mxu1 }
 0x169   : > { %v1078_v14 = vadd.f32 %v1068_v13, %v884_v2  ;;  %v681_v2 = vadd.f32 %v4467_v45, %v4459_v38  ;;  %v1072_v45 = vadd.f32 %v985_v12, %v878_v60 }
 0x16a   : > { %v989_v15 = vpop.f32.mrf.mxu0  ;;  %v1254_v16 = vpop.f32.mrf.mxu1 }
 0x16b   : > { %v1075_v17 = vadd.f32 %v989_v15, %v881_v5  ;;  %v879_v48 = vadd.f32 %v4473_v55, %v681_v2  ;;  %v683_v15 = vadd.f32 %v4469_v47, %v4461_v39 }
 0x16c   : > { %v991_v18 = vpop.f32.mrf.mxu0  ;;  %v4483_v19 = vpop.f32.mrf.mxu1 }
 0x16d   : > { %v1076_v20 = vadd.f32 %v991_v18, %v882_v8  ;;  %v1071_v8 = vadd.f32 %v983_v9, %v877_v61  ;;  %v1073_v38 = vadd.f32 %v4479_v4, %v879_v48  ;;  %v880_v42 = vadd.f32 %v4475_v58, %v683_v15 }
 0x16e   : > { %v1177_v21 = vpop.f32.mrf.mxu0  ;;  %v1260_v22 = vpop.f32.mrf.mxu1 }
 0x16f   : > { %v1271_v23 = vadd.f32 %v1260_v22, %v1077_v11  ;;  %v2099_v22 = vshrl.u32 %v2098_v40, 7  ;;  %v1267_v55 = vadd.f32 %v1254_v16, %v1073_v38 }
 0x170   : > { %v1179_v24 = vpop.f32.mrf.mxu0  ;;  %v1262_v25 = vpop.f32.mrf.mxu1 }
 0x171   : > { %v1272_v26 = vadd.f32 %v1262_v25, %v1078_v14  ;;  %v1265_v14 = vadd.f32 %v1177_v21, %v1071_v8  ;;  %v1074_v21 = vadd.f32 %v4481_v7, %v880_v42  ;;  %v327_v7 = vld [vmem:[%s4922_s2] sm:$0xf]  ;;  %v2112_v15 = vsub.s32 3, %v2099_v22 }
 0x172   : > { %v1183_v27 = vpop.f32.mrf.mxu0 }
 0x173   : > { %v1269_v28 = vadd.f32 %v1183_v27, %v1075_v17  ;;  %v2054_v27 = vpop.permute.xlu1 %2053 }
 0x174   : > { %v1185_v29 = vpop.f32.mrf.mxu0 }
 0x175   : > { %v1270_v30 = vadd.f32 %v1185_v29, %v1076_v20  ;;  %v4499_v20 = vpop.permute.xlu0 %2058 }
 0x176   : > { %v1371_v31 = vpop.f32.mrf.mxu0  ;;  %v1448_v32 = vpop.f32.mrf.mxu1 }
 0x177   : > { %v1459_v18 = vadd.f32 %v1371_v31, %v1265_v14  ;;  %v1461_v47 = vadd.f32 %v1448_v32, %v1267_v55 }
 0x178   : > { %v1373_v33 = vpop.f32.mrf.mxu0  ;;  %v1450_v34 = vpop.f32.mrf.mxu1 }
 0x17a   : > { %v1377_v35 = vpop.f32.mrf.mxu0  ;;  %v1454_v36 = vpop.f32.mrf.mxu1 }
 0x17b   : > { %v1463_v37 = vadd.f32 %v1377_v35, %v1269_v28  ;;  %v1465_v41 = vadd.f32 %v1454_v36, %v1271_v23  ;;  %v1266_v23 = vadd.f32 %v1179_v24, %v1072_v45  ;;  %v1268_v28 = vadd.f32 %v4483_v19, %v1074_v21  ;;  %v2074_v35 = vpop.permute.xlu0 %2073  ;;  %v2079_v21 = vpop.permute.xlu1 %2078 }
 0x17c   : > { %v1379_v43 = vpop.f32.mrf.mxu0  ;;  %v1456_v44 = vpop.f32.mrf.mxu1  ;;  %v4540_v45 = vrot.slane %v327_v7, %v2112_v15 }
 0x17d   : > { %v1464_v46 = vadd.f32 %v1379_v43, %v1270_v30  ;;  %v1466_v49 = vadd.f32 %v1456_v44, %v1272_v26  ;;  %v1460_v26 = vadd.f32 %v1373_v33, %v1266_v23  ;;  %v2100_v30 = vsub.s32 0, %v2099_v22 }
 0x17e   : > { %v1565_v50 = vpop.f32.mrf.mxu0  ;;  %v1642_v52 = vpop.f32.mrf.mxu1  ;;  %v1462_v32 = vadd.f32 %v1450_v34, %v1268_v28 }
 0x17f   : > { %v1653_v63 = vadd.f32 %v1565_v50, %v1459_v18  ;;  %v1655_v31 = vadd.f32 %v1642_v52, %v1461_v47 }
 0x180   : > { %v1567_v53 = vpop.f32.mrf.mxu0  ;;  %v1644_v54 = vpop.f32.mrf.mxu1 }
 0x181   : > { %v1654_v16 = vadd.f32 %v1567_v53, %v1460_v26  ;;  %v1656_v50 = vadd.f32 %v1644_v54, %v1462_v32  ;;  %v2104_v54 = vsub.s32 1, %v2099_v22 }
 0x182   : > { %v1571_v57 = vpop.f32.mrf.mxu0  ;;  %v1648_v59 = vpop.f32.mrf.mxu1 }
 0x183   : > { %v4486_v62 = vadd.f32 %v1571_v57, %v1463_v37  ;;  %v4488_v1 = vadd.f32 %v1648_v59, %v1465_v41  ;;  %v4531_v48 = vrot.slane %v327_v7, %v2104_v54 }
 0x184   : > { %v1573_v3 = vpop.f32.mrf.mxu0  ;;  %v1650_v5 = vpop.f32.mrf.mxu1 }
 0x185   : > { %v1658_v10 = vadd.f32 %v1573_v3, %v1464_v46  ;;  %v1660_v11 = vadd.f32 %v1650_v5, %v1466_v49  ;;  %v4515_v46 = vrot.slane %v327_v7, %v2100_v30  ;;  %v2108_v49 = vsub.s32 2, %v2099_v22 }
 0x186   : > { %v1759_v13 = vpop.f32.mrf.mxu0 }
 0x187   : > { %v1847_v4 = vadd.f32 %v1759_v13, %v1653_v63  ;;  %v4517_v34 = vrot.slane %v327_v7, %v2108_v49 }
 0x188   : > { %v1761_v17 = vpop.f32.mrf.mxu0 }
 0x189   : > { %v1848_v37 = vadd.f32 %v1761_v17, %v1654_v16 }
 0x18a   : > { %v4502_v51 = vpop.f32.mrf.mxu0  ;;  %v1836_v9 = vpop.f32.mrf.mxu1 }
 0x18b   : > { %v1849_v41 = vadd.f32 %v1836_v9, %v1655_v31  ;;  %v1851_v9 = vadd.f32 %v4502_v51, %v4486_v62 }
 0x18c   : > { %v1767_v25 = vpop.f32.mrf.mxu0  ;;  %v1838_v39 = vpop.f32.mrf.mxu1 }
 0x18d   : > { %v4505_v12 = vadd.f32 %v1767_v25, %v1658_v10  ;;  %v1850_v59 = vadd.f32 %v1838_v39, %v1656_v50  ;;  %v3693_v50 = vld [vmem:[%s4927_s7] sm:$0x7] }
 0x18e   : > { %v4508_v58 = vpop.f32.mrf.mxu1  ;;  %v1953_v29 = vpop.f32.mrf.mxu0 }
 0x18f   : > { %v2041_v24 = vadd.f32 %v1953_v29, %v1847_v4  ;;  %v1853_v23 = vadd.f32 %v4508_v58, %v4488_v1 }
 0x190   : > { %v1844_v33 = vpop.f32.mrf.mxu1  ;;  %v1955_v36 = vpop.f32.mrf.mxu0 }
 0x191   : > { %v2061_v43 = vmul.f32 %v2054_v27, %v2041_v24  ;;  %v4513_v44 = vadd.f32 %v1844_v33, %v1660_v11  ;;  %v2042_v52 = vadd.f32 %v1955_v36, %v1848_v37 }
 0x192   : > { %v2030_v19 = vpop.f32.mrf.mxu1  ;;  %v1959_v42 = vpop.f32.mrf.mxu0 }
 0x193   : > { %v2043_v53 = vadd.f32 %v2030_v19, %v1849_v41  ;;  %v2081_v56 = vadd.f32 %v2074_v35, %v2061_v43  ;;  %v2062_v3 = vmul.f32 %v2054_v27, %v2042_v52  ;;  %v2045_v22 = vadd.f32 %v1959_v42, %v1851_v9 }
 0x194   : > { %v2032_v57 = vpop.f32.mrf.mxu1  ;;  %v1961_v51 = vpop.f32.mrf.mxu0 }
 0x195   : > { %v2063_v61 = vmul.f32 %v2054_v27, %v2043_v53  ;;  %v2089_v2 = vmax.f32 %v2081_v56, 0.0  ;;  %v2044_v8 = vadd.f32 %v2032_v57, %v1850_v59  ;;  %v2082_v11 = vadd.f32 %v2074_v35, %v2062_v3 }
 0x196   : > { %v2036_v55 = vpop.f32.mrf.mxu1  ;;  %v2065_v63 = vmul.f32 %v4499_v20, %v2045_v22  ;;  %v2046_v25 = vadd.f32 %v1961_v51, %v4505_v12 }
 0x197   : > { %v2083_v5 = vadd.f32 %v2074_v35, %v2063_v61  ;;  %v4520_v6 = vmul.f32 %v4515_v46, %v2089_v2  ;;  %v2064_v40 = vmul.f32 %v2054_v27, %v2044_v8  ;;  %v2090_v60 = vmax.f32 %v2082_v11, 0.0 }
 0x198   : > { %v2047_v62 = vadd.f32 %v2036_v55, %v1853_v23  ;;  %v2085_v1 = vadd.f32 %v2079_v21, %v2065_v63  ;;  %v2038_v47 = vpop.f32.mrf.mxu1  ;;  %v2066_v26 = vmul.f32 %v4499_v20, %v2046_v25 }
 0x199   : > { %v2091_v10 = vmax.f32 %v2083_v5, 0.0  ;;  %2137 = vrot.lane.b32.xlu0 %v4520_v6, %s4094_s11  ;;  %v2084_v14 = vadd.f32 %v2074_v35, %v2064_v40  ;;  %v4538_v17 = vmul.f32 %v4531_v48, %v2090_v60  ;;  %v2048_v28 = vadd.f32 %v2038_v47, %v4513_v44 }
 0x19a   : > { %v2067_v39 = vmul.f32 %v4499_v20, %v2047_v62  ;;  %v2093_v4 = vmax.f32 %v2085_v1, 0.0  ;;  %v2086_v12 = vadd.f32 %v2079_v21, %v2066_v26 }
 0x19b   : > { %v4525_v13 = vmul.f32 %v4517_v34, %v2091_v10  ;;  %v2092_v38 = vmax.f32 %v2084_v14, 0.0  ;;  %v2068_v30 = vmul.f32 %v4499_v20, %v2048_v28 }
 0x19c   : > { %v2087_v27 = vadd.f32 %v2079_v21, %v2067_v39  ;;  %v4603_v58 = vmul.f32 %v4515_v46, %v2093_v4  ;;  %v2094_v31 = vmax.f32 %v2086_v12, 0.0 }
 0x19d   : > { %2141 = vrot.lane.b32.xlu1 %v4525_v13, %s4094_s11  ;;  %2456 = vrot.lane.b32.xlu0 %v4520_v6, %s4095_s12  ;;  %v4547_v18 = vmul.f32 %v4540_v45, %v2092_v38  ;;  %v2088_v24 = vadd.f32 %v2079_v21, %v2068_v30 }
 0x19e   : > { %v2095_v29 = vmax.f32 %v2087_v27, 0.0  ;;  %v4620_v20 = vmul.f32 %v4531_v48, %v2094_v31 }
 0x19f   : > { %v2096_v7 = vmax.f32 %v2088_v24, 0.0 }
 0x1a0   : > { %v4611_v16 = vmul.f32 %v4517_v34, %v2095_v29 }
 0x1a1   : > { %2460 = vrot.lane.b32.xlu1 %v4525_v13, %s4095_s12  ;;  %2637 = vrot.lane.b32.xlu0 %v4525_v13, %s4096_s13  ;;  %v2125_v35 = vmul.f32 %v4540_v45, %v2096_v7 }
 0x1a5   : > { %2635 = vrot.lane.b32.xlu1 %v4538_v17, %s4096_s13  ;;  %2633 = vrot.lane.b32.xlu0 %v4520_v6, %s4096_s13 }
 0x1a9   : > { %2462 = vrot.lane.b32.xlu1 %v4547_v18, %s4095_s12  ;;  %2814 = vrot.lane.b32.xlu0 %v4525_v13, %s4097_s14 }
 0x1ad   : > { %2812 = vrot.lane.b32.xlu1 %v4538_v17, %s4097_s14  ;;  %2810 = vrot.lane.b32.xlu0 %v4520_v6, %s4097_s14 }
 0x1b1   : > { %2639 = vrot.lane.b32.xlu1 %v4547_v18, %s4096_s13  ;;  %2991 = vrot.lane.b32.xlu0 %v4525_v13, %s4098_s15 }
 0x1b5   : > { %2989 = vrot.lane.b32.xlu1 %v4538_v17, %s4098_s15  ;;  %2987 = vrot.lane.b32.xlu0 %v4520_v6, %s4098_s15 }
 0x1b9   : > { %2816 = vrot.lane.b32.xlu1 %v4547_v18, %s4097_s14  ;;  %3168 = vrot.lane.b32.xlu0 %v4525_v13, %s4099_s16 }
 0x1bd   : > { %3166 = vrot.lane.b32.xlu1 %v4538_v17, %s4099_s16  ;;  %3164 = vrot.lane.b32.xlu0 %v4520_v6, %s4099_s16 }
 0x1c1   : > { %2993 = vrot.lane.b32.xlu1 %v4547_v18, %s4098_s15  ;;  %3345 = vrot.lane.b32.xlu0 %v4525_v13, %s4100_s17 }
 0x1c5   : > { %3343 = vrot.lane.b32.xlu1 %v4538_v17, %s4100_s17  ;;  %3341 = vrot.lane.b32.xlu0 %v4520_v6, %s4100_s17 }
 0x1c9   : > { %3170 = vrot.lane.b32.xlu1 %v4547_v18, %s4099_s16  ;;  %3522 = vrot.lane.b32.xlu0 %v4525_v13, %s4101_s18 }
 0x1cd   : > { %3520 = vrot.lane.b32.xlu1 %v4538_v17, %s4101_s18  ;;  %2139 = vrot.lane.b32.xlu0 %v4538_v17, %s4094_s11 }
 0x1d1   : > { %3347 = vrot.lane.b32.xlu1 %v4547_v18, %s4100_s17  ;;  %2143 = vrot.lane.b32.xlu0 %v4547_v18, %s4094_s11 }
 0x1d5   : > { %2145 = vrot.lane.b32.xlu1 %v4603_v58, %s4094_s11  ;;  %2458 = vrot.lane.b32.xlu0 %v4538_v17, %s4095_s12 }
 0x1d9   : > { %2464 = vrot.lane.b32.xlu1 %v4603_v58, %s4095_s12  ;;  %2149 = vrot.lane.b32.xlu0 %v4611_v16, %s4094_s11 }
 0x1dd   : > { %2147 = vrot.lane.b32.xlu1 %v4620_v20, %s4094_s11  ;;  %2468 = vrot.lane.b32.xlu0 %v4611_v16, %s4095_s12 }
 0x1e1   : > { %2151 = vrot.lane.b32.xlu1 %v2125_v35, %s4094_s11  ;;  %2645 = vrot.lane.b32.xlu0 %v4611_v16, %s4096_s13  ;;  %s4046_s11 = smul.u32 12, %s4930_s28 }
 0x1e5   : > { %2466 = vrot.lane.b32.xlu1 %v4620_v20, %s4095_s12  ;;  %2641 = vrot.lane.b32.xlu0 %v4603_v58, %s4096_s13 }
 0x1e9   : > { %2643 = vrot.lane.b32.xlu1 %v4620_v20, %s4096_s13  ;;  %2822 = vrot.lane.b32.xlu0 %v4611_v16, %s4097_s14 }
 0x1ed   : > { %2470 = vrot.lane.b32.xlu1 %v2125_v35, %s4095_s12  ;;  %2818 = vrot.lane.b32.xlu0 %v4603_v58, %s4097_s14 }
 0x1f1   : > { %2820 = vrot.lane.b32.xlu1 %v4620_v20, %s4097_s14  ;;  %2999 = vrot.lane.b32.xlu0 %v4611_v16, %s4098_s15 }
 0x1f5   : > { %2647 = vrot.lane.b32.xlu1 %v2125_v35, %s4096_s13  ;;  %2995 = vrot.lane.b32.xlu0 %v4603_v58, %s4098_s15 }
 0x1f9   : > { %2997 = vrot.lane.b32.xlu1 %v4620_v20, %s4098_s15  ;;  %3176 = vrot.lane.b32.xlu0 %v4611_v16, %s4099_s16 }
 0x1fd   : > { %2824 = vrot.lane.b32.xlu1 %v2125_v35, %s4097_s14  ;;  %3172 = vrot.lane.b32.xlu0 %v4603_v58, %s4099_s16 }
 0x201   : > { %3174 = vrot.lane.b32.xlu1 %v4620_v20, %s4099_s16  ;;  %3353 = vrot.lane.b32.xlu0 %v4611_v16, %s4100_s17 }
 0x205   : > { %3001 = vrot.lane.b32.xlu1 %v2125_v35, %s4098_s15  ;;  %3349 = vrot.lane.b32.xlu0 %v4603_v58, %s4100_s17 }
 0x209   : > { %3351 = vrot.lane.b32.xlu1 %v4620_v20, %s4100_s17  ;;  %3530 = vrot.lane.b32.xlu0 %v4611_v16, %s4101_s18 }
 0x20b   : > { %v4666_v32 = vpop.permute.xlu0 %2137 }
 0x20d   : > { %3178 = vrot.lane.b32.xlu1 %v2125_v35, %s4099_s16  ;;  %3526 = vrot.lane.b32.xlu0 %v4603_v58, %s4101_s18 }
 0x20f   : > { %v4671_v33 = vpop.permute.xlu1 %2141  ;;  %v4673_v36 = vpop.permute.xlu0 %2456 }
 0x211   : > { %3528 = vrot.lane.b32.xlu1 %v4620_v20, %s4101_s18  ;;  %3518 = vrot.lane.b32.xlu0 %v4520_v6, %s4101_s18 }
 0x213   : > { %v4679_v37 = vpop.permute.xlu1 %2460  ;;  %v2638_v41 = vpop.permute.xlu0 %2637 }
 0x215   : > { %3355 = vrot.lane.b32.xlu1 %v2125_v35, %s4100_s17  ;;  %3524 = vrot.lane.b32.xlu0 %v4547_v18, %s4101_s18  ;;  %s321_s17 = scalar_lea.vmem %s4928_s8, %s4930_s28 }
 0x217   : > { %v2636_v43 = vpop.permute.xlu1 %2635  ;;  %v2634_v44 = vpop.permute.xlu0 %2633 }
 0x218   : > { %v4685_v19 = vsel %vm898_vm4, %v2634_v44, %v2636_v43  ;;  %v4688_v49 = vsel %vm898_vm4, %v2636_v43, %v2638_v41  ;;  %v3927_v43 = vld [vmem:[%s4926_s6 + $0x4] sm:$0x7] }
 0x219   : > { %3532 = vrot.lane.b32.xlu1 %v2125_v35, %s4101_s18  ;;  %3738 = vrot.lane.b32.xlu0 %v4515_v46, %s4097_s14 }
 0x21b   : > { %v2463_v52 = vpop.permute.xlu1 %2462  ;;  %v2815_v53 = vpop.permute.xlu0 %2814 }
 0x21c   : > { %v4698_v56 = vsel %vm704_vm3, %v4679_v37, %v2463_v52 }
 0x21d   : > { %3696 = vperm.xlu1 %4069, %v3693_v50   ;;  %3742 = vrot.lane.b32.xlu0 %v4517_v34, %s4097_s14 }
 0x21f   : > { %v2813_v57 = vpop.permute.xlu1 %2812  ;;  %v2811_v59 = vpop.permute.xlu0 %2810 }
 0x220   : > { %v4703_v61 = vsel %vm1092_vm5, %v2811_v59, %v2813_v57  ;;  %v4706_v46 = vsel %vm1092_vm5, %v2813_v57, %v2815_v53  ;;  %v3932_v59 = vld [vmem:[%s4926_s6 + $0x8] sm:$0x7] }
 0x221   : > { %3740 = vrot.lane.b32.xlu1 %v4531_v48, %s4097_s14 }
 0x223   : > { %v2640_v2 = vpop.permute.xlu1 %2639  ;;  %v2992_v3 = vpop.permute.xlu0 %2991 }
 0x224   : > { %v4711_v5 = vsel %vm898_vm4, %v2638_v41, %v2640_v2 }
 0x225   : > { %3744 = vrot.lane.b32.xlu1 %v4540_v45, %s4097_s14  ;;  %s318_s14 = scalar_lea.vmem %s4921_s1, %s4046_s11 }
 0x227   : > { %v2990_v34 = vpop.permute.xlu1 %2989  ;;  %v2988_v8 = vpop.permute.xlu0 %2987 }
 0x228   : > { %v4716_v10 = vsel %vm1286_vm6, %v2988_v8, %v2990_v34  ;;  %v4719_v54 = vsel %vm1286_vm6, %v2990_v34, %v2992_v3 }
 0x22b   : > { %v2817_v11 = vpop.permute.xlu1 %2816  ;;  %v3169_v40 = vpop.permute.xlu0 %3168 }
 0x22c   : > { %v4722_v48 = vsel %vm1092_vm5, %v2815_v53, %v2817_v11 }
 0x22f   : > { %v3167_v60 = vpop.permute.xlu1 %3166  ;;  %v3165_v14 = vpop.permute.xlu0 %3164 }
 0x230   : > { %v4725_v15 = vsel %vm1480_vm7, %v3165_v14, %v3167_v60  ;;  %v4728_v38 = vsel %vm1480_vm7, %v3167_v60, %v3169_v40  ;;  %v3938_v60 = vld [vmem:[%s4926_s6 + $0x10] sm:$0x7] }
 0x233   : > { %v2994_v45 = vpop.permute.xlu1 %2993  ;;  %v3346_v18 = vpop.permute.xlu0 %3345 }
 0x234   : > { %v4731_v42 = vsel %vm1286_vm6, %v2992_v3, %v2994_v45 }
 0x237   : > { %v3344_v9 = vpop.permute.xlu1 %3343  ;;  %v3342_v22 = vpop.permute.xlu0 %3341 }
 0x238   : > { %v4734_v55 = vsel %vm1674_vm8, %v3342_v22, %v3344_v9  ;;  %v4737_v23 = vsel %vm1674_vm8, %v3344_v9, %v3346_v18 }
 0x23b   : > { %v3171_v63 = vpop.permute.xlu1 %3170  ;;  %v4739_v62 = vpop.permute.xlu0 %3522 }
 0x23c   : > { %v4742_v51 = vsel %vm1480_vm7, %v3169_v40, %v3171_v63 }
 0x23f   : > { %v4744_v21 = vpop.permute.xlu1 %3520  ;;  %v2140_v25 = vpop.permute.xlu0 %2139 }
 0x240   : > { %v2154_v24 = vsel %vm348_vm0, %v2140_v25, %v4671_v33  ;;  %v2153_v7 = vsel %vm348_vm0, %v4666_v32, %v2140_v25 }
 0x243   : > { %v3348_v1 = vpop.permute.xlu1 %3347  ;;  %v2144_v39 = vpop.permute.xlu0 %2143 }
 0x244   : > { %v4747_v47 = vsel %vm1674_vm8, %v3346_v18, %v3348_v1  ;;  %v2155_v50 = vsel %vm348_vm0, %v4671_v33, %v2144_v39 }
 0x247   : > { %v2146_v26 = vpop.permute.xlu1 %2145  ;;  %v2459_v4 = vpop.permute.xlu0 %2458 }
 0x248   : > { %v2473_v57 = vsel %vm704_vm3, %v2459_v4, %v4679_v37 }
 0x24b   : > { %v2465_v27 = vpop.permute.xlu1 %2464  ;;  %v2150_v28 = vpop.permute.xlu0 %2149 }
 0x24f   : > { %v2148_v12 = vpop.permute.xlu1 %2147  ;;  %v2469_v29 = vpop.permute.xlu0 %2468 }
 0x250   : > { %v2156_v30 = vsel %vm348_vm0, %v2146_v26, %v2148_v12  ;;  %v2157_v31 = vsel %vm348_vm0, %v2148_v12, %v2150_v28 }
 0x251   : > { %2197 = vmatprep.subr.mxu0 %v2157_v31 }
 0x252   : > { %2198 = vmatpush1.msra.mxu0 %v2156_v30 }
 0x253   : > { %v2152_v35 = vpop.permute.xlu1 %2151  ;;  %2199 = vmatprep.subr.mxu0 %v2154_v24  ;;  %v4755_v41 = vpop.permute.xlu0 %2645 }
 0x254   : > { %v2158_v44 = vsel %vm348_vm0, %v2150_v28, %v2152_v35  ;;  %2200 = vmatpush1.msra.mxu0 %v2153_v7 }
 0x255   : > { %3983 = vmatpush3.msra.mxu1 %v2158_v44  ;;  %2341 = vmatprep.subr.mxu0 %v4620_v20  ;;  %v2126_v20 = vld [vmem:[%s4926_s6] sm:$0x7] }
 0x256   : > { %3928 = vmatmul.mubr.msk.f32.vlgmr.msra.gmra.mxu0 %vm2165_vm11, %v3927_v43  ;;  %3984 = vmatprep.subr.mxu1 %v4093_v0 }
 0x257   : > { %2342 = vmatpush1.msra.mxu0 %v4603_v58  ;;  %v2467_v32 = vpop.permute.xlu1 %2466  ;;  %3985 = vmatpush3.msra.mxu1 %v2155_v50  ;;  %v2642_v52 = vpop.permute.xlu0 %2641 }
 0x258   : > { %2343 = vmatprep.subr.mxu0 %v4538_v17  ;;  %3989 = vmatprep.subr.mxu1 %v4093_v0  ;;  %v2476_v53 = vsel %vm704_vm3, %v2467_v32, %v2469_v29  ;;  %v2475_v33 = vsel %vm704_vm3, %v2465_v27, %v2467_v32 }
 0x259   : > { %2344 = vmatpush1.msra.mxu0 %v4520_v6  ;;  %3987 = vmatmul.mubr.msk.f32.vlgmr.msra.gmra.mxu1 %vm2165_vm11, %v3927_v43 }
 0x25a   : > { %2377 = vmatprep.mubr.f32.mxu0 %v4093_v0  ;;  %3990 = vmatpush3.msra.mxu1 %v4611_v16  ;;  %v2472_v16 = vsel %vm704_vm3, %v4673_v36, %v2459_v4 }
 0x25b   : > { %2515 = vmatprep.subr.mxu0 %v2476_v53  ;;  %3930 = vmatmul.mubr.msk.f32.vlgmr.msra.gmra.mxu0 %vm2165_vm11, %v2126_v20  ;;  %v2644_v17 = vpop.permute.xlu1 %2643  ;;  %v4779_v58 = vpop.permute.xlu0 %2822 }
 0x25c   : > { %3991 = vmatprep.subr.mxu1 %v4093_v0  ;;  %2516 = vmatpush1.msra.mxu0 %v2475_v33  ;;  %v2653_v6 = vsel %vm898_vm4, %v2644_v17, %v4755_v41  ;;  %v2652_v2 = vsel %vm898_vm4, %v2642_v52, %v2644_v17 }
 0x25d   : > { %3992 = vmatpush3.msra.mxu1 %v4525_v13  ;;  %2517 = vmatprep.subr.mxu0 %v2473_v57  ;;  %v3935_v13 = vld [vmem:[%s4926_s6 + $0xc] sm:$0x7] }
 0x25e   : > { %2518 = vmatpush1.msra.mxu0 %v2472_v16  ;;  %2551 = vmatprep.mubr.f32.mxu0 %v4093_v0 }
 0x25f   : > { %2692 = vmatprep.subr.mxu0 %v2653_v6  ;;  %3933 = vmatmul.mubr.msk.f32.vlgmr.msra.gmra.mxu0 %vm2165_vm11, %v3932_v59  ;;  %v2471_v37 = vpop.permute.xlu1 %2470  ;;  %v2819_v3 = vpop.permute.xlu0 %2818 }
 0x260   : > { %2693 = vmatpush1.msra.mxu0 %v2652_v2  ;;  %v2477_v34 = vsel %vm704_vm3, %v2469_v29, %v2471_v37  ;;  %3993 = vmatprep.mubr.msk.f32.mxu1 %vm4103_vm10, %v4093_v0 }
 0x261   : > { %2694 = vmatprep.subr.mxu0 %v4688_v49  ;;  %3996 = vmatprep.subr.mxu1 %v4093_v0 }
 0x262   : > { %2695 = vmatpush1.msra.mxu0 %v4685_v19  ;;  %3994 = vmatmul.mubr.msk.f32.vlgmr.msra.gmra.mxu1 %vm2165_vm11, %v2126_v20 }
 0x263   : > { %3997 = vmatpush3.msra.mxu1 %v2477_v34  ;;  %v2821_v36 = vpop.permute.xlu1 %2820  ;;  %v3000_v8 = vpop.permute.xlu0 %2999  ;;  %2728 = vmatprep.mubr.f32.mxu0 %v4093_v0 }
 0x264   : > { %3998 = vmatprep.subr.mxu1 %v4093_v0  ;;  %v2829_v11 = vsel %vm1092_vm5, %v2819_v3, %v2821_v36  ;;  %v2830_v49 = vsel %vm1092_vm5, %v2821_v36, %v4779_v58  ;;  %3936 = vmatmul.mubr.msk.f32.vlgmr.msra.gmra.mxu0 %vm2165_vm11, %v3935_v13 }
 0x265   : > { %3999 = vmatpush3.msra.mxu1 %v4698_v56  ;;  %2869 = vmatprep.subr.mxu0 %v2830_v49 }
 0x266   : > { %2870 = vmatpush1.msra.mxu0 %v2829_v11  ;;  %4000 = vmatprep.mubr.msk.f32.mxu1 %vm4103_vm10, %v4093_v0 }
 0x267   : > { %v2648_v19 = vpop.permute.xlu1 %2647  ;;  %2871 = vmatprep.subr.mxu0 %v4706_v46  ;;  %v2996_v40 = vpop.permute.xlu0 %2995  ;;  %4003 = vmatprep.subr.mxu1 %v4093_v0 }
 0x268   : > { %v2654_v14 = vsel %vm898_vm4, %v4755_v41, %v2648_v19  ;;  %2872 = vmatpush1.msra.mxu0 %v4703_v61  ;;  %4001 = vmatmul.mubr.msk.f32.vlgmr.msra.gmra.mxu1 %vm2165_vm11, %v3932_v59 }
 0x269   : > { %4004 = vmatpush3.msra.mxu1 %v2654_v14  ;;  %2905 = vmatprep.mubr.f32.mxu0 %v4093_v0 }
 0x26a   : > { %4005 = vmatprep.subr.mxu1 %v4093_v0  ;;  %3939 = vmatmul.mubr.msk.f32.vlgmr.msra.gmra.mxu0 %vm2165_vm11, %v3938_v60 }
 0x26b   : > { %v2998_v56 = vpop.permute.xlu1 %2997  ;;  %4006 = vmatpush3.msra.mxu1 %v4711_v5  ;;  %v3177_v46 = vpop.permute.xlu0 %3176  ;;  %4007 = vmatprep.mubr.msk.f32.mxu1 %vm4103_vm10, %v4093_v0  ;;  %v3941_v5 = vld [vmem:[%s4926_s6 + $0x14] sm:$0x7] }
 0x26c   : > { %v3006_v45 = vsel %vm1286_vm6, %v2996_v40, %v2998_v56  ;;  %v3007_v61 = vsel %vm1286_vm6, %v2998_v56, %v3000_v8  ;;  %4010 = vmatprep.subr.mxu1 %v4093_v0  ;;  %4008 = vmatmul.mubr.msk.f32.vlgmr.msra.gmra.mxu1 %vm2165_vm11, %v3935_v13 }
 0x26d   : > { %3046 = vmatprep.subr.mxu0 %v3007_v61  ;;  %3082 = vmatprep.mubr.f32.mxu0 %v4093_v0 }
 0x26e   : > { %3047 = vmatpush1.msra.mxu0 %v3006_v45  ;;  %4014 = vmatprep.mubr.msk.f32.mxu1 %vm4103_vm10, %v4093_v0 }
 0x26f   : > { %v2825_v18 = vpop.permute.xlu1 %2824  ;;  %3048 = vmatprep.subr.mxu0 %v4719_v54  ;;  %v3173_v9 = vpop.permute.xlu0 %3172 }
 0x270   : > { %v2831_v22 = vsel %vm1092_vm5, %v4779_v58, %v2825_v18  ;;  %3049 = vmatpush1.msra.mxu0 %v4716_v10  ;;  %v3944_v10 = vld [vmem:[%s4926_s6 + $0x18] sm:$0x7] }
 0x271   : > { %4011 = vmatpush3.msra.mxu1 %v2831_v22  ;;  %3942 = vmatmul.mubr.msk.f32.vlgmr.msra.gmra.mxu0 %vm2165_vm11, %v3941_v5 }
 0x272   : > { %4012 = vmatprep.subr.mxu1 %v4093_v0  ;;  %3259 = vmatprep.mubr.f32.mxu0 %v4093_v0 }
 0x273   : > { %v3175_v63 = vpop.permute.xlu1 %3174  ;;  %4013 = vmatpush3.msra.mxu1 %v4722_v48  ;;  %v3354_v25 = vpop.permute.xlu0 %3353 }
 0x274   : > { %v3183_v1 = vsel %vm1480_vm7, %v3173_v9, %v3175_v63  ;;  %v3184_v54 = vsel %vm1480_vm7, %v3175_v63, %v3177_v46  ;;  %4017 = vmatprep.subr.mxu1 %v4093_v0  ;;  %4015 = vmatmul.mubr.msk.f32.vlgmr.msra.gmra.mxu1 %vm2165_vm11, %v3938_v60 }
 0x275   : > { %3223 = vmatprep.subr.mxu0 %v3184_v54  ;;  %4021 = vmatprep.mubr.msk.f32.mxu1 %vm4103_vm10, %v4093_v0 }
 0x276   : > { %3224 = vmatpush1.msra.mxu0 %v3183_v1 }
 0x277   : > { %v3002_v39 = vpop.permute.xlu1 %3001  ;;  %3225 = vmatprep.subr.mxu0 %v4728_v38  ;;  %v3350_v48 = vpop.permute.xlu0 %3349 }
 0x278   : > { %v3008_v26 = vsel %vm1286_vm6, %v3000_v8, %v3002_v39  ;;  %3226 = vmatpush1.msra.mxu0 %v4725_v15  ;;  %v3947_v15 = vld [vmem:[%s4926_s6 + $0x1c] sm:$0x7] }
 0x279   : > { %4018 = vmatpush3.msra.mxu1 %v3008_v26  ;;  %3945 = vmatmul.mubr.msk.f32.vlgmr.msra.gmra.mxu0 %vm2165_vm11, %v3944_v10 }
 0x27a   : > { %4019 = vmatprep.subr.mxu1 %v4093_v0  ;;  %3436 = vmatprep.mubr.f32.mxu0 %v4093_v0 }
 0x27b   : > { %v3352_v4 = vpop.permute.xlu1 %3351  ;;  %4020 = vmatpush3.msra.mxu1 %v4731_v42  ;;  %v3531_v27 = vpop.permute.xlu0 %3530 }
 0x27c   : > { %v3360_v28 = vsel %vm1674_vm8, %v3350_v48, %v3352_v4  ;;  %v3361_v38 = vsel %vm1674_vm8, %v3352_v4, %v3354_v25  ;;  %4022 = vmatmul.mubr.msk.f32.vlgmr.msra.gmra.mxu1 %vm2165_vm11, %v3941_v5  ;;  %4024 = vmatprep.subr.mxu1 %v4093_v0 }
 0x27d   : > { %3400 = vmatprep.subr.mxu0 %v3361_v38  ;;  %4028 = vmatprep.mubr.msk.f32.mxu1 %vm4103_vm10, %v4093_v0 }
 0x27e   : > { %3401 = vmatpush1.msra.mxu0 %v3360_v28 }
 0x27f   : > { %v3179_v12 = vpop.permute.xlu1 %3178  ;;  %3402 = vmatprep.subr.mxu0 %v4737_v23  ;;  %v3527_v42 = vpop.permute.xlu0 %3526 }
 0x280   : > { %v3185_v29 = vsel %vm1480_vm7, %v3177_v46, %v3179_v12  ;;  %3403 = vmatpush1.msra.mxu0 %v4734_v55  ;;  %v3535_v55 = vsel %vm1868_vm9, %v4744_v21, %v4739_v62 }
 0x281   : > { %4025 = vmatpush3.msra.mxu1 %v3185_v29  ;;  %3948 = vmatmul.mubr.msk.f32.vlgmr.msra.gmra.mxu0 %vm2165_vm11, %v3947_v15 }
 0x282   : > { %4026 = vmatprep.subr.mxu1 %v4093_v0  ;;  %3613 = vmatprep.mubr.f32.mxu0 %v4093_v0 }
 0x283   : > { %v3529_v30 = vpop.permute.xlu1 %3528  ;;  %4027 = vmatpush3.msra.mxu1 %v4742_v51  ;;  %v3519_v24 = vpop.permute.xlu0 %3518  ;;  %v3950_v51 = vld [vmem:[%s4926_s6 + $0x20] sm:$0x7] }
 0x284   : > { %v3537_v31 = vsel %vm1868_vm9, %v3527_v42, %v3529_v30  ;;  %4029 = vmatmul.mubr.msk.f32.vlgmr.msra.gmra.mxu1 %vm2165_vm11, %v3944_v10  ;;  %v3538_v23 = vsel %vm1868_vm9, %v3529_v30, %v3531_v27  ;;  %4031 = vmatprep.subr.mxu1 %v4093_v0  ;;  %v3534_v7 = vsel %vm1868_vm9, %v3519_v24, %v4744_v21 }
 0x285   : > { %3577 = vmatprep.subr.mxu0 %v3538_v23  ;;  %4035 = vmatprep.mubr.msk.f32.mxu1 %vm4103_vm10, %v4093_v0 }
 0x286   : > { %3578 = vmatpush1.msra.mxu0 %v3537_v31 }
 0x287   : > { %v3356_v35 = vpop.permute.xlu1 %3355  ;;  %3579 = vmatprep.subr.mxu0 %v3535_v55  ;;  %v3525_v43 = vpop.permute.xlu0 %3524 }
 0x288   : > { %v3362_v41 = vsel %vm1674_vm8, %v3354_v25, %v3356_v35  ;;  %3580 = vmatpush1.msra.mxu0 %v3534_v7  ;;  %v3536_v21 = vsel %vm1868_vm9, %v4739_v62, %v3525_v43 }
 0x289   : > { %4032 = vmatpush3.msra.mxu1 %v3362_v41  ;;  %3951 = vmatmul.mubr.msk.f32.vlgmr.msra.gmra.mxu0 %vm2165_vm11, %v3950_v51 }
 0x28a   : > { %4033 = vmatprep.subr.mxu1 %v4093_v0 }
 0x28b   : > { %v3533_v44 = vpop.permute.xlu1 %3532  ;;  %4034 = vmatpush3.msra.mxu1 %v4747_v47 }
 0x28c   : > { %v3539_v50 = vsel %vm1868_vm9, %v3531_v27, %v3533_v44  ;;  %4036 = vmatmul.mubr.msk.f32.vlgmr.msra.gmra.mxu1 %vm2165_vm11, %v3947_v15  ;;  %4038 = vmatprep.subr.mxu1 %v4093_v0 }
 0x28d   : > { %4039 = vmatpush3.msra.mxu1 %v3539_v50  ;;  %4042 = vmatprep.mubr.msk.f32.mxu1 %vm4103_vm10, %v4093_v0 }
 0x28e   : > { %4040 = vmatprep.subr.mxu1 %v4093_v0 }
 0x28f   : > { %4041 = vmatpush3.msra.mxu1 %v3536_v21 }
 0x290   : > { %4043 = vmatmul.mubr.msk.f32.vlgmr.msra.gmra.mxu1 %vm2165_vm11, %v3950_v51 }
 0x298   : > { %v3697_v29 = vpop.permute.xlu1 %3696 }
 0x316   : > { %v2235_v32 = vpop.f32.mrf.mxu0 }
 0x318   : > { %v2237_v47 = vpop.f32.mrf.mxu0 }
 0x319   : > { %v2306_v52 = vpop.f32.mrf.mxu1 }
 0x31b   : > { %v2379_v53 = vpop.f32.mrf.mxu0  ;;  %v3988_v20 = vpop.f32.mrf.mxu1 }
 0x31c   : > { %v2380_v13 = vadd.f32 %v2379_v53, %v2235_v32 }
 0x31d   : > { %v2381_v33 = vpop.f32.mrf.mxu0 }
 0x31e   : > { %v2382_v8 = vadd.f32 %v2381_v33, %v2237_v47 }
 0x31f   : > { %v2553_v17 = vpop.f32.mrf.mxu0 }
 0x320   : > { %v2628_v19 = vadd.f32 %v2553_v17, %v2380_v13 }
 0x321   : > { %v2555_v57 = vpop.f32.mrf.mxu0 }
 0x322   : > { %v2450_v58 = vpop.f32.mrf.mxu1  ;;  %v2629_v40 = vadd.f32 %v2555_v57, %v2382_v8 }
 0x323   : > { %v2451_v46 = vadd.f32 %v2450_v58, %v2306_v52 }
 0x324   : > { %v3995_v6 = vpop.f32.mrf.mxu1  ;;  %v2730_v59 = vpop.f32.mrf.mxu0 }
 0x325   : > { %v2805_v14 = vadd.f32 %v2730_v59, %v2628_v19  ;;  %v326_v19 = vld [vmem:[%s318_s14 + $0x8] sm:$0x7] }
 0x326   : > { %v2732_v37 = vpop.f32.mrf.mxu0 }
 0x327   : > { %v2806_v61 = vadd.f32 %v2732_v37, %v2629_v40 }
 0x328   : > { %v2624_v16 = vpop.f32.mrf.mxu1 }
 0x329   : > { %v2630_v9 = vadd.f32 %v2624_v16, %v2451_v46 }
 0x32a   : > { %v4002_v2 = vpop.f32.mrf.mxu1  ;;  %v2907_v0 = vpop.f32.mrf.mxu0 }
 0x32b   : > { %v2982_v18 = vadd.f32 %v2907_v0, %v2805_v14 }
 0x32c   : > { %v2801_v62 = vpop.f32.mrf.mxu1  ;;  %v2909_v34 = vpop.f32.mrf.mxu0 }
 0x32d   : > { %v2983_v63 = vadd.f32 %v2909_v34, %v2806_v61  ;;  %v2807_v10 = vadd.f32 %v2801_v62, %v2630_v9  ;;  %v325_v62 = vld [vmem:[%s318_s14] sm:$0x77]  ;;  %v3739_v34 = vpop.permute.xlu0 %3738 }
 0x32e   : > { %v4009_v3 = vpop.f32.mrf.mxu1  ;;  %v3706_v0 = vcombine.high %v325_v62, %v325_v62 }
 0x331   : > { %v3084_v49 = vpop.f32.mrf.mxu0 }
 0x332   : > { %v3159_v1 = vadd.f32 %v3084_v49, %v2982_v18 }
 0x333   : > { %v3086_v60 = vpop.f32.mrf.mxu0 }
 0x334   : > { %v2978_v36 = vpop.f32.mrf.mxu1  ;;  %v3160_v39 = vadd.f32 %v3086_v60, %v2983_v63  ;;  %v3743_v60 = vpop.permute.xlu0 %3742 }
 0x335   : > { %v2984_v38 = vadd.f32 %v2978_v36, %v2807_v10 }
 0x336   : > { %v4016_v11 = vpop.f32.mrf.mxu1 }
 0x339   : > { %v3261_v45 = vpop.f32.mrf.mxu0 }
 0x33a   : > { %v3336_v48 = vadd.f32 %v3261_v45, %v3159_v1 }
 0x33b   : > { %v3263_v22 = vpop.f32.mrf.mxu0 }
 0x33c   : > { %v3155_v56 = vpop.f32.mrf.mxu1  ;;  %v3337_v27 = vadd.f32 %v3263_v22, %v3160_v39 }
 0x33d   : > { %v3161_v30 = vadd.f32 %v3155_v56, %v2984_v38  ;;  %v3741_v56 = vpop.permute.xlu1 %3740 }
 0x33e   : > { %v4023_v5 = vpop.f32.mrf.mxu1  ;;  %v3747_v22 = vsel %vm1092_vm5, %v3741_v56, %v3743_v60  ;;  %v3746_v63 = vsel %vm1092_vm5, %v3739_v34, %v3741_v56 }
 0x341   : > { %v3438_v25 = vpop.f32.mrf.mxu0  ;;  %v3745_v39 = vpop.permute.xlu1 %3744 }
 0x342   : > { %v3513_v28 = vadd.f32 %v3438_v25, %v3336_v48 }
 0x343   : > { %v3440_v4 = vpop.f32.mrf.mxu0 }
 0x344   : > { %v3332_v54 = vpop.f32.mrf.mxu1  ;;  %v3514_v12 = vadd.f32 %v3440_v4, %v3337_v27 }
 0x345   : > { %v3338_v51 = vadd.f32 %v3332_v54, %v3161_v30 }
 0x346   : > { %v4030_v26 = vpop.f32.mrf.mxu1 }
 0x349   : > { %v3615_v15 = vpop.f32.mrf.mxu0 }
 0x34a   : > { %v3690_v42 = vadd.f32 %v3615_v15, %v3513_v28  ;;  %v3748_v28 = vsel %vm1092_vm5, %v3743_v60, %v3745_v39 }
 0x34b   : > { %v3617_v31 = vpop.f32.mrf.mxu0 }
 0x34c   : > { %v3699_v24 = vadd.f32 %v3697_v29, %v3690_v42  ;;  %v3691_v23 = vadd.f32 %v3617_v31, %v3514_v12  ;;  %v3509_v55 = vpop.f32.mrf.mxu1 }
 0x34d   : > { %v3515_v43 = vadd.f32 %v3509_v55, %v3338_v51 }
 0x34e   : > { %v3714_v7 = vand.u32 2147483647, %v3699_v24  ;;  %v3700_v35 = vadd.f32 %v3697_v29, %v3691_v23  ;;  %v4037_v41 = vpop.f32.mrf.mxu1  ;;  %v3702_v13 = vmax.f32 %v3699_v24, 0.0  ;;  %v3708_v36 = vmul.f32 %v3699_v24, %v325_v62 }
 0x350   : > { %v3717_v44 = vsub.f32 0.0, %v3714_v7  ;;  %v3715_v50 = vand.u32 2147483647, %v3700_v35  ;;  %v3686_v21 = vpop.f32.mrf.mxu1  ;;  %v3703_v8 = vmax.f32 %v3700_v35, 0.0  ;;  %v3709_v11 = vmul.f32 %v3706_v0, %v3700_v35 }
 0x351   : > { %v3692_v32 = vadd.f32 %v3686_v21, %v3515_v43  ;;  %v3711_v46 = vsub.f32 %v3702_v13, %v3708_v36 }
 0x352   : > { %v3720_v47 = vmul.f32 1.442695, %v3717_v44  ;;  %v3718_v52 = vsub.f32 0.0, %v3715_v50  ;;  %v4044_v53 = vpop.f32.mrf.mxu1  ;;  %v3712_v45 = vsub.f32 %v3703_v8, %v3709_v11 }
 0x353   : > { %v3701_v20 = vadd.f32 %v3697_v29, %v3692_v32 }
 0x354   : > { %4073 = vpow2.f32 %v3720_v47  ;;  %v3722_v33 = vmul.f32 1.442695, %v3718_v52 }
 0x355   : > { %v3716_v17 = vand.u32 2147483647, %v3701_v20  ;;  %v3704_v5 = vmax.f32 %v3701_v20, 0.0  ;;  %v3710_v18 = vmul.f32 %v3701_v20, %v326_v19 }
 0x356   : > { %4075 = vpow2.f32 %v3722_v33 }
 0x357   : > { %v3719_v58 = vsub.f32 0.0, %v3716_v17  ;;  %v3713_v48 = vsub.f32 %v3704_v5, %v3710_v18 }
 0x359   : > { %v3724_v57 = vmul.f32 1.442695, %v3719_v58 }
 0x35b   : > { %4077 = vpow2.f32 %v3724_v57 }
 0x361   : > { %v4074_v6 = vpop.eup %4073 }
 0x362   : > { %v3726_v59 = vadd.f32 1.0, %v4074_v6 }
 0x363   : > { %v4076_v16 = vpop.eup %4075 }
 0x364   : > { %4079 = vlog2.f32 %v3726_v59  ;;  %v3727_v2 = vadd.f32 1.0, %v4076_v16 }
 0x366   : > { %4081 = vlog2.f32 %v3727_v2 }
 0x368   : > { %v4078_v37 = vpop.eup %4077 }
 0x369   : > { %v3728_v3 = vadd.f32 1.0, %v4078_v37 }
 0x36b   : > { %4083 = vlog2.f32 %v3728_v3 }
 0x371   : > { %v4080_v49 = vpop.eup %4079 }
 0x372   : > { %v3730_v40 = vmul.f32 0.6931472, %v4080_v49 }
 0x373   : > { %v4082_v14 = vpop.eup %4081 }
 0x374   : > { %v3732_v61 = vmul.f32 0.6931472, %v4082_v14  ;;  %v3735_v9 = vadd.f32 %v3730_v40, %v3711_v46 }
 0x376   : > { %v3736_v25 = vadd.f32 %v3732_v61, %v3712_v45  ;;  %v3752_v10 = vmul.f32 %v3746_v63, %v3735_v9 }
 0x378   : > { %v4084_v1 = vpop.eup %4083  ;;  %v3753_v54 = vmul.f32 %v3747_v22, %v3736_v25  ;;  %v3756_v38 = vsel %vm3755_vm12, %v3752_v10, 0.0 }
 0x379   : > { %v3734_v26 = vmul.f32 0.6931472, %v4084_v1 }
 0x37a   : > { %v3757_v4 = vsel %vm3755_vm12, %v3753_v54, 0.0 }
 0x37b   : > { %v3737_v27 = vadd.f32 %v3734_v26, %v3713_v48  ;;  %v3758_v12 = vadd.f32 %v3757_v4, %v3756_v38 }
 0x37d   : > { %v3754_v15 = vmul.f32 %v3748_v28, %v3737_v27 }
 0x37f   : > { %v3759_v42 = vsel %vm3755_vm12, %v3754_v15, 0.0 }
 0x380   : > { %v3760_v29 = vadd.f32 %v3759_v42, %v3758_v12 }
 0x382   : > { %3761 = vadd.xlane.f32.xlu0 %v3760_v29 }
 0x40b   : > { %v3762_v30 = vpop.xlane.xlu0 %3761 }
 0x40c   : > { %v3763_v31 = vrot.slane %v3762_v30, 4 }
 0x40e   : > { %v3764_v24 = vadd.f32 %v3763_v31, %v3762_v30 }
 0x410   : > { %v3765_v23 = vrot.slane %v3764_v24, 2 }
 0x412   : > { %v3766_v55 = vadd.f32 %v3765_v23, %v3764_v24 }
 0x414   : > { %v3767_v51 = vrot.slane %v3766_v55, 1 }
 0x416   : > { %v3768_v7 = vadd.f32 %v3767_v51, %v3766_v55 }
 0x418   : > { %4047 = vpush %v3768_v7 }
 0x449   : > { %s4048_s18 = spop %4047 }
 0x44a   : > { %v3770_v35 = vstv %s4048_s18 }
 0x44b   : > { %3772 = vst.msk [vmem:[%s321_s17] sm:$0x1] %vm3771_vm13, %v3770_v35 }
 0x44c PF: > { %s18_s27 = sadd.s32 1, %s4091_s27  }
 0x44d   : > { %p15_p4 = scmp.ge.s32.totalorder %s18_s27, 4  }
 0x44f   :  { %17 = sbr.rel (!%p15_p4) target bundleno = 1 (0x1), region = 101 }

</bundles_post_ra>
